<compile_context>
chip_gen: v7x
topology: tpu7x:2x2x1
jax: 0.10.0
libtpu: 0.0.40
codegen_flags: <defaults>
</compile_context>

<pallas_src>
import functools

import jax
import jax.numpy as jnp
from jax.experimental import pallas as pl
from jax.experimental.pallas import tpu as pltpu


def _round_up(x, m):
    return ((x + m - 1) // m) * m


def _scatter_kernel(blk_ref, nck_ref,        # scalar prefetch (SMEM): per-tile chunk info
                    iota_ref,                # (TL, KB) int32 row-index iota, VMEM resident
                    g_ref,                   # (NCH, 1, KB) int32 sorted, chunked gidx
                    f_ref,                   # (NCH, C, KB) sorted, chunked features^T
                    out_ref,                 # (C, TL) one BEV lane tile
                    *, TL, tpb):
    b = pl.program_id(0)
    j = pl.program_id(1)
    t = b * tpb + j                          # global tile id
    base = t * TL                            # key of this tile's lane 0
    blk0 = blk_ref[t]                        # first pillar chunk overlapping the tile
    nck = nck_ref[t]                         # number of chunks overlapping the tile

    @pl.when(nck == 0)                       # empty tile: just write zeros
    def _():
        out_ref[...] = jnp.zeros_like(out_ref)

    @pl.when(nck > 0)
    def _():
        def chunk(ci):
            # rel[p] = gidx[p] - base; pillar p lands in lane rel[p] of this tile.
            rel = g_ref[blk0 + ci] - base                             # (1, KB) tiny op
            onehot_t = (rel == iota_ref[...]).astype(f_ref.dtype)     # (TL, KB)
            # (C, KB) x (TL, KB) contracted on the last dims -> (C, TL).  This is
            # the native MXU "q @ k^T" path, so the one-hot is not transposed.
            # At most one nonzero per output column => f32 accumulation is exact.
            return jax.lax.dot_general(
                f_ref[blk0 + ci], onehot_t,
                dimension_numbers=(((1,), (1,)), ((), ())),
                preferred_element_type=jnp.float32)

        # First chunk overwrites (no zero-init read-modify-write in the common
        # single-chunk case); any remaining chunks accumulate.
        out_ref[...] = chunk(0).astype(out_ref.dtype)

        def body(ci, carry):
            out_ref[...] = out_ref[...] + chunk(ci).astype(out_ref.dtype)
            return carry

        jax.lax.fori_loop(1, nck, body, 0)


def pointpillar_scatter(pillar_features, coords, num_bev_features, nx, ny, nz=1,
                        batch_size=None, tile_l=2048, kb=256):
    """Scatter (P, C) pillar features into a dense (B, C, ny, nx) BEV grid.

    Forward semantics match pcdet's PointPillarScatter (nz == 1).  Pass
    `batch_size` statically; deriving it from coords forces a device->host sync.

    tile_l: output lanes per grid step (multiple of 128; 2048 is a good default
            on v6e/v7x, 1024 on v5e).
    kb:     pillar chunk width for the one-hot matmul (128-256).
    """
    assert nz == 1
    L = nx * ny
    P, C = pillar_features.shape
    assert C == num_bev_features

    if batch_size is None:
        # Fallback only: blocking readback + untraceable under jit.
        batch_size = int(coords[:, 0].max()) + 1

    # Lane tile: either the whole row (full-extent block, always legal) or a
    # 128-multiple <= L so every non-final block is an unmasked lane-dense store.
    tile_l = max(128, _round_up(int(tile_l), 128))
    if L <= tile_l:
        TL = L
        tpb = 1
    else:
        TL = min(tile_l, (L // 128) * 128)
        tpb = pl.cdiv(L, TL)
    KB = max(128, _round_up(int(kb), 128))
    L_pad = tpb * TL                          # padded per-batch key extent
    num_tiles = batch_size * tpb

    # Global sort key: b * L_pad + (z + y*nx + x), z == 0 since nz == 1.
    lin = (coords[:, 1] + coords[:, 2] * nx + coords[:, 3]).astype(jnp.int32)
    gidx = coords[:, 0].astype(jnp.int32) * L_pad + lin

    # Sort pillars by destination tile (sorting by gidx sorts by tile).
    order = jnp.argsort(gidx)
    gidx_s = gidx[order]
    feats_s = pillar_features[order]

    # Tile t covers keys [t*TL, (t+1)*TL); searchsorted on the boundaries gives
    # each tile's (start, end) range in the sorted pillar list.
    bounds = jnp.arange(num_tiles + 1, dtype=jnp.int32) * TL
    edges = jnp.searchsorted(gidx_s, bounds, side="left").astype(jnp.int32)
    start, end = edges[:-1], edges[1:]
    cnt = end - start
    blk0 = (start // KB).astype(jnp.int32)                    # first overlapping chunk
    blk_last = jnp.where(cnt > 0, (end - 1) // KB, blk0)
    nchunks = jnp.where(cnt > 0, blk_last - blk0 + 1, 0).astype(jnp.int32)

    # Chunked pillar data, KB pillars per chunk, lane-dense.  Padded gidx = -1
    # never matches a lane; padded features are zero.
    P_pad = _round_up(max(P, 1), KB)
    NCH = P_pad // KB
    feats_pad = jnp.zeros((P_pad, C), pillar_features.dtype).at[:P].set(feats_s)
    feats_chunked = feats_pad.reshape(NCH, KB, C).transpose(0, 2, 1)   # (NCH, C, KB)
    gidx_chunked = (jnp.full((P_pad,), -1, jnp.int32).at[:P].set(gidx_s)
                    .reshape(NCH, 1, KB))

    # Base-independent row-index iota, built once and kept VMEM-resident so the
    # kernel never regenerates it per tile.
    row_iota = jax.lax.broadcasted_iota(jnp.int32, (TL, KB), 0)

    kernel = functools.partial(_scatter_kernel, TL=TL, tpb=tpb)

    def whole3(b, j, blk, nck):      # constant block index -> DMA'd once, stays resident
        return (0, 0, 0)

    def whole2(b, j, blk, nck):
        return (0, 0)

    def out_map(b, j, blk, nck):
        return (b, 0, j)

    # Scoped-VMEM budget: resident inputs (x2 pipeline buffers), double-buffered
    # output tile, per-chunk one-hot temporaries, plus headroom.
    itemsize = jnp.dtype(pillar_features.dtype).itemsize
    need = (2 * TL * KB * 4                      # row iota
            + 2 * NCH * 8 * KB * 4               # gidx chunks (sublane-padded)
            + 2 * NCH * C * KB * itemsize        # feature chunks
            + 2 * C * TL * itemsize              # output tile
            + 4 * TL * KB * 4)                   # one-hot temporaries
    vmem_limit_bytes = int(min(48 * 1024 * 1024,
                               max(16 * 1024 * 1024, (need * 3) // 2)))

    out = pl.pallas_call(
        kernel,
        out_shape=jax.ShapeDtypeStruct((batch_size, C, L), pillar_features.dtype),
        grid_spec=pltpu.PrefetchScalarGridSpec(
            num_scalar_prefetch=2,
            grid=(batch_size, tpb),
            in_specs=[
                pl.BlockSpec((TL, KB), whole2),          # row-index iota
                pl.BlockSpec((NCH, 1, KB), whole3),      # chunked gidx
                pl.BlockSpec((NCH, C, KB), whole3),      # chunked features
            ],
            out_specs=pl.BlockSpec((None, C, TL), out_map),
        ),
        compiler_params=pltpu.CompilerParams(
            dimension_semantics=("parallel", "parallel"),
            vmem_limit_bytes=vmem_limit_bytes),
    )(blk0, nchunks, row_iota, gidx_chunked, feats_chunked)

    # (B, C, L) -> (B, C*nz, ny, nx), identical to the PyTorch .view(); no crop.
    return out.reshape(batch_size, C * nz, ny, nx)


if __name__ == "__main__":
    key = jax.random.PRNGKey(0)
    keys = jax.random.split(key, 5)

    batch_size = 3
    num_bev_features = 64          # model_cfg.NUM_BEV_FEATURES
    nx, ny, nz = 24, 24, 1         # grid_size
    L = nx * ny

    # Unique per-batch voxel coords: [batch_idx, z(=0), y, x].
    # b0/b1 span the whole grid; b2 is restricted to y < 8 so that some lane
    # tiles in the small-tile config are completely empty.
    pillars_per_batch = (400, 300, 150)
    cell_range = (L, L, 8 * nx)
    coords_list = []
    for b in range(batch_size):
        cells = jax.random.permutation(keys[b], cell_range[b])[:pillars_per_batch[b]]
        y = cells // nx
        x = cells % nx
        c = jnp.stack(
            [jnp.full_like(cells, b), jnp.zeros_like(cells), y, x], axis=1)
        coords_list.append(c)
    coords = jnp.concatenate(coords_list, axis=0).astype(jnp.int32)
    P = coords.shape[0]

    pillar_features = jax.random.normal(keys[3], (P, num_bev_features), jnp.float32)

    # pure-JAX reference of the PyTorch scatter semantics
    lin = coords[:, 1] + coords[:, 2] * nx + coords[:, 3]

    def reference(feats):
        ref = jnp.zeros((batch_size, num_bev_features, L), jnp.float32)
        ref = ref.at[coords[:, 0], :, lin].set(feats)
        return ref.reshape(batch_size, num_bev_features, ny, nx)

    # Main path (default TL/KB; exercises the multi-chunk loop + full-extent block).
    spatial_features = pointpillar_scatter(
        pillar_features, coords, num_bev_features, nx, ny, nz,
        batch_size=batch_size)
    spatial_features = jax.block_until_ready(spatial_features)
    assert spatial_features.shape == (batch_size, num_bev_features, ny, nx)
    assert jnp.allclose(spatial_features, reference(pillar_features), atol=1e-5), \
        "mismatch vs reference (default tiles)"

    # Small-tile config: several tiles per batch, empty tiles for batch 2, and a
    # partial (masked) final tile -- exercises every kernel path.
    sf_small = pointpillar_scatter(
        pillar_features, coords, num_bev_features, nx, ny, nz,
        batch_size=batch_size, tile_l=256, kb=128)
    sf_small = jax.block_until_ready(sf_small)
    assert jnp.allclose(sf_small, reference(pillar_features), atol=1e-5), \
        "mismatch vs reference (small tiles)"

    # USE_EMPTY_VOXEL path: identical scatter applied to empty_pillar_features /
    # coordinates_empty (here reusing the same coords with different features).
    empty_pillar_features = jax.random.normal(
        keys[4], (P, num_bev_features), jnp.float32)
    empty_features = pointpillar_scatter(
        empty_pillar_features, coords, num_bev_features, nx, ny, nz,
        batch_size=batch_size)
    empty_features = jax.block_until_ready(empty_features)
    assert jnp.allclose(empty_features, reference(empty_pillar_features), atol=1e-5), \
        "mismatch vs reference (empty-voxel path)"

    print("KERNEL_OK")
</pallas_src>

<mosaic_0001>
module attributes {stable_mosaic.version = 11 : i64} {
  func.func @_scatter_kernel(%arg0: i32, %arg1: i32, %arg2: memref<3xi32, #tpu.memory_space<smem>>, %arg3: memref<3xi32, #tpu.memory_space<smem>>, %arg4: memref<576x256xi32, #tpu.memory_space<vmem>>, %arg5: memref<4x1x256xi32, #tpu.memory_space<vmem>>, %arg6: memref<4x64x256xf32, #tpu.memory_space<vmem>>, %arg7: memref<1x64x576xf32, #tpu.memory_space<vmem>>) attributes {dimension_semantics = [#tpu.dimension_semantics<parallel>, #tpu.dimension_semantics<parallel>], iteration_bounds = array<i64: 3, 1>, scalar_prefetch = 2 : i64, scratch_operands = 0 : i64, tpu.core_type = #tpu.core_type<tc>, window_params = [{pipeline_mode = #tpu.pipeline_mode<synchronous>, transform_indices = @transform_0, window_bounds = array<i64: 576, 256>}, {pipeline_mode = #tpu.pipeline_mode<synchronous>, transform_indices = @transform_1, window_bounds = array<i64: 4, 1, 256>}, {pipeline_mode = #tpu.pipeline_mode<synchronous>, transform_indices = @transform_2, window_bounds = array<i64: 4, 64, 256>}, {transform_indices = @transform_3, window_bounds = array<i64: 1, 64, 576>}]} {
    %c1_i32 = arith.constant 1 : i32
    %0 = arith.muli %arg0, %c1_i32 : i32
    %1 = arith.addi %0, %arg1 : i32
    %c576_i32 = arith.constant 576 : i32
    %2 = arith.muli %1, %c576_i32 : i32
    %3 = arith.index_cast %1 : i32 to index
    %4 = memref.load %arg2[%3] : memref<3xi32, #tpu.memory_space<smem>>
    %5 = arith.index_cast %1 : i32 to index
    %6 = memref.load %arg3[%5] : memref<3xi32, #tpu.memory_space<smem>>
    %c0_i32 = arith.constant 0 : i32
    %7 = arith.cmpi eq, %6, %c0_i32 : i32
    %8 = arith.extui %7 : i1 to i32
    %c0_i32_0 = arith.constant 0 : i32
    %9 = arith.cmpi ne, %8, %c0_i32_0 : i32
    scf.if %9 {
      %cst = arith.constant 0.000000e+00 : f32
      %13 = vector.broadcast %cst : f32 to vector<64x576xf32>
      %c0 = arith.constant 0 : index
      %c0_3 = arith.constant 0 : index
      %c0_4 = arith.constant 0 : index
      %14 = vector.load %arg7[%c0, %c0_3, %c0_4] : memref<1x64x576xf32, #tpu.memory_space<vmem>>, vector<1x64x576xf32>
      %15 = vector.shape_cast %14 : vector<1x64x576xf32> to vector<64x576xf32>
      %16 = vector.shape_cast %13 : vector<64x576xf32> to vector<1x64x576xf32>
      tpu.vector_store %arg7[%c0, %c0_3, %c0_4], %16 {strides = array<i32>} : memref<1x64x576xf32, #tpu.memory_space<vmem>>, vector<1x64x576xf32>,
    } else {
    }
    %c0_i32_1 = arith.constant 0 : i32
    %10 = arith.cmpi sgt, %6, %c0_i32_1 : i32
    %11 = arith.extui %10 : i1 to i32
    %c0_i32_2 = arith.constant 0 : i32
    %12 = arith.cmpi ne, %11, %c0_i32_2 : i32
    scf.if %12 {
      %c0_i32_3 = arith.constant 0 : i32
      %13 = arith.addi %4, %c0_i32_3 : i32
      %14 = arith.index_cast %13 : i32 to index
      %c0 = arith.constant 0 : index
      %c0_4 = arith.constant 0 : index
      %15 = vector.load %arg5[%14, %c0, %c0_4] : memref<4x1x256xi32, #tpu.memory_space<vmem>>, vector<1x1x256xi32>
      %16 = vector.shape_cast %15 : vector<1x1x256xi32> to vector<1x256xi32>
      %17 = vector.broadcast %2 : i32 to vector<1x256xi32>
      %18 = arith.subi %16, %17 : vector<1x256xi32>
      %c0_5 = arith.constant 0 : index
      %c0_6 = arith.constant 0 : index
      %19 = vector.load %arg4[%c0_5, %c0_6] : memref<576x256xi32, #tpu.memory_space<vmem>>, vector<576x256xi32>
      %20 = vector.broadcast %18 : vector<1x256xi32> to vector<576x256xi32>
      %21 = arith.cmpi eq, %20, %19 : vector<576x256xi32>
      %22 = arith.extui %21 : vector<576x256xi1> to vector<576x256xi32>
      %23 = arith.sitofp %22 : vector<576x256xi32> to vector<576x256xf32>
      %c0_i32_7 = arith.constant 0 : i32
      %24 = arith.addi %4, %c0_i32_7 : i32
      %25 = arith.index_cast %24 : i32 to index
      %c0_8 = arith.constant 0 : index
      %c0_9 = arith.constant 0 : index
      %26 = vector.load %arg6[%25, %c0_8, %c0_9] : memref<4x64x256xf32, #tpu.memory_space<vmem>>, vector<1x64x256xf32>
      %27 = vector.shape_cast %26 : vector<1x64x256xf32> to vector<64x256xf32>
      %cst = arith.constant dense<0.000000e+00> : vector<64x576xf32>
      %28 = tpu.matmul %27, %23, %cst {dimension_numbers = #tpu.dot_dimension_numbers<[1], [1], [0], [0], [0, 0, 1, 0], [], []>} : vector<64x256xf32>, vector<576x256xf32>, vector<64x576xf32> -> vector<64x576xf32>
      %c0_10 = arith.constant 0 : index
      %c0_11 = arith.constant 0 : index
      %c0_12 = arith.constant 0 : index
      %29 = vector.load %arg7[%c0_10, %c0_11, %c0_12] : memref<1x64x576xf32, #tpu.memory_space<vmem>>, vector<1x64x576xf32>
      %30 = vector.shape_cast %29 : vector<1x64x576xf32> to vector<64x576xf32>
      %31 = vector.shape_cast %28 : vector<64x576xf32> to vector<1x64x576xf32>
      tpu.vector_store %arg7[%c0_10, %c0_11, %c0_12], %31 {strides = array<i32>} : memref<1x64x576xf32, #tpu.memory_space<vmem>>, vector<1x64x576xf32>,
      %c0_i32_13 = arith.constant 0 : i32
      %c1_i32_14 = arith.constant 1 : i32
      %32 = arith.subi %6, %c1_i32_14 : i32
      %33 = arith.addi %c1_i32_14, %32 : i32
      %c1_i32_15 = arith.constant 1 : i32
      scf.for %arg8 = %c1_i32_14 to %33 step %c1_i32_15  : i32 {
        %c0_16 = arith.constant 0 : index
        %c0_17 = arith.constant 0 : index
        %c0_18 = arith.constant 0 : index
        %34 = vector.load %arg7[%c0_16, %c0_17, %c0_18] : memref<1x64x576xf32, #tpu.memory_space<vmem>>, vector<1x64x576xf32>
        %35 = vector.shape_cast %34 : vector<1x64x576xf32> to vector<64x576xf32>
        %36 = arith.addi %4, %arg8 : i32
        %37 = arith.index_cast %36 : i32 to index
        %c0_19 = arith.constant 0 : index
        %c0_20 = arith.constant 0 : index
        %38 = vector.load %arg5[%37, %c0_19, %c0_20] : memref<4x1x256xi32, #tpu.memory_space<vmem>>, vector<1x1x256xi32>
        %39 = vector.shape_cast %38 : vector<1x1x256xi32> to vector<1x256xi32>
        %40 = vector.broadcast %2 : i32 to vector<1x256xi32>
        %41 = arith.subi %39, %40 : vector<1x256xi32>
        %c0_21 = arith.constant 0 : index
        %c0_22 = arith.constant 0 : index
        %42 = vector.load %arg4[%c0_21, %c0_22] : memref<576x256xi32, #tpu.memory_space<vmem>>, vector<576x256xi32>
        %43 = vector.broadcast %41 : vector<1x256xi32> to vector<576x256xi32>
        %44 = arith.cmpi eq, %43, %42 : vector<576x256xi32>
        %45 = arith.extui %44 : vector<576x256xi1> to vector<576x256xi32>
        %46 = arith.sitofp %45 : vector<576x256xi32> to vector<576x256xf32>
        %47 = arith.addi %4, %arg8 : i32
        %48 = arith.index_cast %47 : i32 to index
        %c0_23 = arith.constant 0 : index
        %c0_24 = arith.constant 0 : index
        %49 = vector.load %arg6[%48, %c0_23, %c0_24] : memref<4x64x256xf32, #tpu.memory_space<vmem>>, vector<1x64x256xf32>
        %50 = vector.shape_cast %49 : vector<1x64x256xf32> to vector<64x256xf32>
        %cst_25 = arith.constant dense<0.000000e+00> : vector<64x576xf32>
        %51 = tpu.matmul %50, %46, %cst_25 {dimension_numbers = #tpu.dot_dimension_numbers<[1], [1], [0], [0], [0, 0, 1, 0], [], []>} : vector<64x256xf32>, vector<576x256xf32>, vector<64x576xf32> -> vector<64x576xf32>
        %52 = arith.addf %35, %51 : vector<64x576xf32>
        %c0_26 = arith.constant 0 : index
        %c0_27 = arith.constant 0 : index
        %c0_28 = arith.constant 0 : index
        %53 = vector.load %arg7[%c0_26, %c0_27, %c0_28] : memref<1x64x576xf32, #tpu.memory_space<vmem>>, vector<1x64x576xf32>
        %54 = vector.shape_cast %53 : vector<1x64x576xf32> to vector<64x576xf32>
        %55 = vector.shape_cast %52 : vector<64x576xf32> to vector<1x64x576xf32>
        tpu.vector_store %arg7[%c0_26, %c0_27, %c0_28], %55 {strides = array<i32>} : memref<1x64x576xf32, #tpu.memory_space<vmem>>, vector<1x64x576xf32>,
      }
    } else {
    }
    return
  }
  func.func @transform_0(%arg0: i32, %arg1: i32, %arg2: memref<3xi32, #tpu.memory_space<smem>>, %arg3: memref<3xi32, #tpu.memory_space<smem>>) -> (i32, i32) {
    %c0_i32 = arith.constant 0 : i32
    %c0_i32_0 = arith.constant 0 : i32
    %c0_i32_1 = arith.constant 0 : i32
    return %c0_i32, %c0_i32_0 : i32, i32
  }
  func.func @transform_1(%arg0: i32, %arg1: i32, %arg2: memref<3xi32, #tpu.memory_space<smem>>, %arg3: memref<3xi32, #tpu.memory_space<smem>>) -> (i32, i32, i32) {
    %c0_i32 = arith.constant 0 : i32
    %c0_i32_0 = arith.constant 0 : i32
    %c0_i32_1 = arith.constant 0 : i32
    %c0_i32_2 = arith.constant 0 : i32
    return %c0_i32, %c0_i32_0, %c0_i32_1 : i32, i32, i32
  }
  func.func @transform_2(%arg0: i32, %arg1: i32, %arg2: memref<3xi32, #tpu.memory_space<smem>>, %arg3: memref<3xi32, #tpu.memory_space<smem>>) -> (i32, i32, i32) {
    %c0_i32 = arith.constant 0 : i32
    %c0_i32_0 = arith.constant 0 : i32
    %c0_i32_1 = arith.constant 0 : i32
    %c0_i32_2 = arith.constant 0 : i32
    return %c0_i32, %c0_i32_0, %c0_i32_1 : i32, i32, i32
  }
  func.func @transform_3(%arg0: i32, %arg1: i32, %arg2: memref<3xi32, #tpu.memory_space<smem>>, %arg3: memref<3xi32, #tpu.memory_space<smem>>) -> (i32, i32, i32) {
    %c0_i32 = arith.constant 0 : i32
    %c0_i32_0 = arith.constant 0 : i32
    return %arg0, %c0_i32, %arg1 : i32, i32, i32
  }
}

</mosaic_0001>

<bundles_post_ra>
// kernel: tpu_custom_call.1
= control target key start
LH: loop header
LB: loop body
LE: loop exit
PB: predicated region body
PF: predicated region fallthrough
CT: control target
= control target key end

     0   :  { %s4693_s0 = inlined_call_operand.hbm [shape: s32[3], index: 0, kind: input, shape index: {}]   ;;  %s4694_s2 = inlined_call_operand.hbm [shape: s32[576,256], index: 2, kind: input, shape index: {}]   ;;  %s4695_s3 = inlined_call_operand.vmem [shape: s32[4,1,256], index: 3, kind: input, shape index: {}]   ;;  %s4696_s4 = inlined_call_operand.hbm [shape: f32[4,64,256], index: 4, kind: input, shape index: {}]   ;;  %s4697_s5 = inlined_call_operand.hbm [shape: f32[3,64,576], index: 5, kind: output, shape index: {}]   ;;  %s4698_s1 = inlined_call_operand.vmem [shape: s32[3], index: 1, kind: input, shape index: {}]  }
   0x1   :  { %s3413_s20 = scalar_lea.hbm %s4693_s0, 16 }
   0x2   :  { %p3414_p0 = scmp.ne.s32.totalorder %s4693_s0, %s3413_s20  ;;  %p3417_p1 = scmp.lt.u32.totalorder %s3413_s20, %s4693_s0 }
   0x4   :  { %p3419_p2 = pnand %p3417_p1, %p3414_p0 }
   0x6   :  { %3422 = shalt.err (!%p3419_p2)  }
   0x7   :  { %s3589_s25 = smov [#allocation3]   ;;  %s12_s30 = sshll.u32 %s4698_s1, 4  ;;  %s13_s30 = int_to_ptr.vmem [resolvable:$true] %s12_s30 }
   0x8   :  { %11 = dma.hbm_to_smem %s4693_s0, 16, %s3589_s25, [#allocation2] }
   0x9   :  { %s3423_s6 = scalar_lea.vmem %s13_s30, 16  ;;  %p3428_p4 = scmp.lt.s32.totalorder %s13_s30, %s13_s30 }
   0xa   :  { %p3424_p3 = scmp.ne.s32.totalorder %s13_s30, %s3423_s6  ;;  %p3429_p5 = scmp.lt.s32.totalorder %s3423_s6, %s3423_s6 }
   0xc   :  { %p3430_p6 = por %p3429_p5, %p3428_p4 }
   0xe   :  { %p3431_p7 = pnand %p3430_p6, %p3424_p3 }
  0x10   :  { %3434 = shalt.err (!%p3431_p7)  }
  0x11   :  { %s3590_s7 = smov [#allocation4]  }
  0x12   :  { %15 = dma.vmem_to_smem %s13_s30, 16, %s3590_s7, [#allocation2] }
  0x13   :  { %3547 = dma.done.wait [#allocation2], 32 }
  0x14   :  { %3548 = vsyncadd [#allocation2], 4294967264 }
  0x15   :  { %17 = sfence }
  0x16   :  { %18 = vsyncpa [#allocation6], 0 }
  0x17   :  { %19 = vsyncpa [#allocation9], 0 }
  0x18   :  { %20 = vsyncpa [#allocation7], 0 }
  0x19   :  { %22 = vsyncpa [#allocation7 + $0x1], 0  ;;  %s3646_s0 = smov 0   ;;  %s3648_s1 = smov 0  }
  0x1a   :  { %s3650_s8 = smov 0   ;;  %s3652_s9 = smov 0  }
  0x1b   :  { %s3654_s10 = smov 0   ;;  %s3656_s11 = smov 0  }
  0x1c LB: > { %s2416_s12 = sadd.s32 4294967295, %s3583_s11   ;;  %s2417_s13 = sadd.s32 4294967294, %s3583_s11   ;;  %s3583_s11 = sphi %s3656_s11, %s28_s11   ;;  %s3579_s10 = sphi %s3654_s10, %s4724_s10   ;;  %s3575_s9 = sphi %s3652_s9, %s4723_s9   ;;  %s3571_s8 = sphi %s3650_s8, %s4722_s8   ;;  %s3567_s1 = sphi %s3648_s1, %s4721_s1   ;;  %s3563_s0 = sphi %s3646_s0, %s4720_s0  }
  0x1d   : > { %s40_s14 = sadd.s32 1, %s3579_s10  ;;  %s112_s15 = sadd.s32 1, %s3571_s8 }
  0x1e   : > { %p42_p8 = scmp.ge.s32.totalorder %s40_s14, 3  ;;  %p122_p9 = scmp.ne.s32.totalorder %s3571_s8, %s3567_s1 }
  0x1f   : > { %p123_p10 = scmp.eq.s32.totalorder %s2416_s12, 2  ;;  %p128_p11 = scmp.ne.s32.totalorder %s3567_s1, %s3563_s0 }
  0x20   : > { %s4726_s14 = smov (%p42_p8, %s40_s14), 0  ;;  %p129_p13 = scmp.eq.s32.totalorder %s2417_s13, 2 }
  0x21   : > { %p3686_p12 = por %p123_p10, %p122_p9  ;;  %s107_s17 = ssub.s32 %s3579_s10, %s4726_s14 }
  0x22   : > { %p2418_p0 = scmp.ge.s32.totalorder %s3583_s11, 1  ;;  %p110_p1 = scmp.eq.s32.totalorder %s107_s17, 0 }
  0x23   : > { %s4703_s16 = scalar_select %p3686_p12, 1, 0 }
  0x24   : > { %p3693_p2 = por %p129_p13, %p128_p11  ;;  %p136_p3 = scmp.lt.s32.totalorder %s3583_s11, 4 }
  0x25   : > { %s3699_s19 = scalar_select %p110_p1, %s3571_s8, %s112_s15  }
  0x26   : > { %s4704_s18 = scalar_select %p3693_p2, 1, 0 }
  0x27   : > { %p3701_p4 = pnand %p2418_p0, %p136_p3  ;;  %p3705_p5 = scmp.eq.s32.totalorder %s2416_s12, 0 }
  0x28   : > { %s3591_s22 = smov [#allocation5]   ;;  %s3592_s25 = smov [#allocation8]  }
  0x29   : > { %s4705_s20 = scalar_select %p3701_p4, 1, 0 }
  0x2a   : > { %s4706_s21 = scalar_select %p3705_p5, 1, 0 }
  0x2b   : > { %p3330_p6 = pneg %p3701_p4  ;;  %s148_s23 = sshll.u32 %s3591_s22, 4  ;;  %s149_s23 = int_to_ptr.vmem [resolvable:$true] %s148_s23 }
  0x2c   : > { %s164_s26 = sshll.u32 %s3592_s25, 4  ;;  %s3435_s29 = scalar_lea.hbm %s4694_s2, 18432  ;;  %s3717_s26 = int_to_ptr.vmem [resolvable:$true] %s164_s26 }
  0x2d   : > { %p3713_p7 = pnand %p3705_p5, %p3330_p6  ;;  %p3436_p8 = scmp.ne.s32.totalorder %s4694_s2, %s3435_s29 }
  0x2e   : > { %p3442_p13 = scmp.lt.u32.totalorder %s3435_s29, %s4694_s2 }
  0x2f   : > { %p3437_p9 = pneg %p3713_p7 }
  0x31   : > { %p3438_p10 = pnand %p3437_p9, %p3436_p8 }
  0x33   : > { %p3439_p11 = pneg %p3438_p10 }
  0x35   : > { %p3444_p0 = pnand %p3442_p13, %p3439_p11 }
  0x37   : > { %3447 = shalt.err (!%p3444_p0)
}
  0x38   : > { %s3448_s13 = scalar_lea.vmem %s149_s23, 18432  ;;  %p3456_p2 = scmp.lt.s32.totalorder %s149_s23, %s149_s23 }
  0x39   : > { %p3449_p1 = scmp.ne.s32.totalorder %s149_s23, %s3448_s13  ;;  %p3457_p12 = scmp.lt.s32.totalorder %s3448_s13, %s3448_s13 }
  0x3b   : > { %p3451_p3 = pnand %p3449_p1, %p3437_p9  ;;  %p3458_p5 = por %p3457_p12, %p3456_p2 }
  0x3d   : > { %p3452_p6 = pneg %p3451_p3 }
  0x3f   : > { %p3459_p4 = pnand %p3458_p5, %p3452_p6 }
  0x41   : > { %3462 = shalt.err (!%p3459_p4)
}
  0x42   : > { %s3593_s15 = smov 256   ;;  %s3594_s17 = smov 16  }
  0x43   : > { %3333 = dma.hbm_to_vmem [thread:$0]  (!%p3713_p7), %s4694_s2, 18432, %s149_s23, [#allocation6], %s3593_s15, %s3593_s15, %s3594_s17  }
  0x44   : > { %s3463_s29 = scalar_lea.hbm %s4696_s4, 8192 }
  0x45   : > { %p3464_p8 = scmp.ne.s32.totalorder %s4696_s4, %s3463_s29  ;;  %p3470_p4 = scmp.lt.u32.totalorder %s3463_s29, %s4696_s4 }
  0x47   : > { %p3466_p12 = pnand %p3464_p8, %p3437_p9 }
  0x49   : > { %p3467_p2 = pneg %p3466_p12 }
  0x4b   : > { %p3472_p5 = pnand %p3470_p4, %p3467_p2 }
  0x4d   : > { %3475 = shalt.err (!%p3472_p5)
}
  0x4e   : > { %s3476_s23 = scalar_lea.vmem %s3717_s26, 8192  ;;  %p3484_p0 = scmp.lt.s32.totalorder %s3717_s26, %s3717_s26 }
  0x4f   : > { %p3477_p10 = scmp.ne.s32.totalorder %s3717_s26, %s3476_s23  ;;  %p3485_p1 = scmp.lt.s32.totalorder %s3476_s23, %s3476_s23 }
  0x51   : > { %p3479_p11 = pnand %p3477_p10, %p3437_p9  ;;  %p3486_p3 = por %p3485_p1, %p3484_p0 }
  0x53   : > { %p3480_p13 = pneg %p3479_p11 }
  0x55   : > { %p3487_p6 = pnand %p3486_p3, %p3480_p13 }
  0x57   : > { %3490 = shalt.err (!%p3487_p6)
}
  0x58   : > { %3336 = dma.hbm_to_vmem [thread:$0]  (!%p3713_p7), %s4696_s4, 8192, %s3717_s26, [#allocation9], %s3593_s15, %s3593_s15, %s3594_s17  }
  0x59   : > { %p4708_p8 = scmp.ne.s32.totalorder %s4705_s20, 0 }
  0x5a   : > { %p4709_p12 = scmp.ne.s32.totalorder (!%p4708_p8), %s4706_s21, 0 }
  0x5b   : > { %180 = sbr.rel (%p4708_p8) target bundleno = 954 (0x3ba), region = 32 }
  0x62   : > { %3550 = dma.done.wait (%p4709_p12), [#allocation6], 18432  }
  0x63   : > { %3552 = vsyncadd (%p4709_p12), [#allocation6], 4294948864 }
  0x64   : > { %3554 = dma.done.wait (%p4709_p12), [#allocation9], 8192  }
  0x65   : > { %3556 = vsyncadd (%p4709_p12), [#allocation9], 4294959104  ;;  %s200_s24 = sand.u32 1, %s3567_s1   ;;  %s205_s20 = smul.u32 576, %s3575_s9 }
  0x66   : > { %s3779_s26 = sld [smem:[#allocation3 + %s3575_s9]]  ;;  %s3318_s17 = smul.u32 320, %s200_s24 }
  0x67   : > { %s3782_s15 = sld [smem:[#allocation4 + %s3575_s9]] }
  0x68   : > { %s3786_s25 = scalar_lea.vmem [#allocation10], %s3318_s17 }
  0x6d   : > { %p2424_p7 = scmp.ne.s32.totalorder %s3782_s15, 0 }
  0x6e   : > { %vm216_vm0 = vcmask (!%p2424_p7), 523264   ;;  %v3595_v0 = vmov (!%p2424_p7), 0.0  }
  0x6f   : > { %211 = sbr.rel (%p2424_p7) target bundleno = 131 (0x83), region = 44  ;;  %212 = vst [vmem:[%s3786_s25] sm:$0xff] (!%p2424_p7), %v3595_v0  ;;  %213 = vst [vmem:[%s3786_s25 + $0x8] sm:$0xff] (!%p2424_p7), %v3595_v0 }
  0x70   : > { %214 = vst [vmem:[%s3786_s25 + $0x10] sm:$0xff] (!%p2424_p7), %v3595_v0  ;;  %215 = vst [vmem:[%s3786_s25 + $0x18] sm:$0xff] (!%p2424_p7), %v3595_v0 }
  0x71   : > { %218 = vst [vmem:[%s3786_s25 + $0x28] sm:$0xff] (!%p2424_p7), %v3595_v0  ;;  %219 = vst [vmem:[%s3786_s25 + $0x30] sm:$0xff] (!%p2424_p7), %v3595_v0 }
  0x72   : > { %220 = vst [vmem:[%s3786_s25 + $0x38] sm:$0xff] (!%p2424_p7), %v3595_v0  ;;  %221 = vst [vmem:[%s3786_s25 + $0x40] sm:$0xff] (!%p2424_p7), %v3595_v0 }
  0x73   : > { %223 = vst [vmem:[%s3786_s25 + $0x50] sm:$0xff] (!%p2424_p7), %v3595_v0  ;;  %224 = vst [vmem:[%s3786_s25 + $0x58] sm:$0xff] (!%p2424_p7), %v3595_v0 }
  0x74   : > { %225 = vst [vmem:[%s3786_s25 + $0x60] sm:$0xff] (!%p2424_p7), %v3595_v0  ;;  %226 = vst [vmem:[%s3786_s25 + $0x68] sm:$0xff] (!%p2424_p7), %v3595_v0 }
  0x75   : > { %228 = vst [vmem:[%s3786_s25 + $0x78] sm:$0xff] (!%p2424_p7), %v3595_v0  ;;  %229 = vst [vmem:[%s3786_s25 + $0x80] sm:$0xff] (!%p2424_p7), %v3595_v0 }
  0x76   : > { %230 = vst [vmem:[%s3786_s25 + $0x88] sm:$0xff] %v3595_v0  ;;  %231 = vst [vmem:[%s3786_s25 + $0x90] sm:$0xff] %v3595_v0 }
  0x77   : > { %233 = vst [vmem:[%s3786_s25 + $0xa0] sm:$0xff] %v3595_v0  ;;  %234 = vst [vmem:[%s3786_s25 + $0xa8] sm:$0xff] %v3595_v0 }
  0x78   : > { %235 = vst [vmem:[%s3786_s25 + $0xb0] sm:$0xff] %v3595_v0  ;;  %236 = vst [vmem:[%s3786_s25 + $0xb8] sm:$0xff] %v3595_v0 }
  0x79   : > { %238 = vst [vmem:[%s3786_s25 + $0xc8] sm:$0xff] %v3595_v0  ;;  %239 = vst [vmem:[%s3786_s25 + $0xd0] sm:$0xff] %v3595_v0 }
  0x7a   : > { %240 = vst [vmem:[%s3786_s25 + $0xd8] sm:$0xff] %v3595_v0  ;;  %241 = vst [vmem:[%s3786_s25 + $0xe0] sm:$0xff] %v3595_v0 }
  0x7b   : > { %243 = vst [vmem:[%s3786_s25 + $0xf0] sm:$0xff] %v3595_v0  ;;  %244 = vst [vmem:[%s3786_s25 + $0xf8] sm:$0xff] %v3595_v0 }
  0x7c   : > { %245 = vst [vmem:[%s3786_s25 + $0x100] sm:$0xff] %v3595_v0  ;;  %246 = vst [vmem:[%s3786_s25 + $0x108] sm:$0xff] %v3595_v0 }
  0x7d   : > { %248 = vst [vmem:[%s3786_s25 + $0x118] sm:$0xff] %v3595_v0  ;;  %249 = vst [vmem:[%s3786_s25 + $0x120] sm:$0xff] %v3595_v0 }
  0x7e   : > { %250 = vst [vmem:[%s3786_s25 + $0x128] sm:$0xff] %v3595_v0  ;;  %251 = vst [vmem:[%s3786_s25 + $0x130] sm:$0xff] %v3595_v0 }
  0x7f   : > { %217 = vst.msk [vmem:[%s3786_s25 + $0x20] sm:$0xff] %vm216_vm0, %v3595_v0  ;;  %222 = vst.msk [vmem:[%s3786_s25 + $0x48] sm:$0xff] %vm216_vm0, %v3595_v0 }
  0x80   : > { %227 = vst.msk [vmem:[%s3786_s25 + $0x70] sm:$0xff] %vm216_vm0, %v3595_v0  ;;  %232 = vst.msk [vmem:[%s3786_s25 + $0x98] sm:$0xff] %vm216_vm0, %v3595_v0 }
  0x81   : > { %237 = vst.msk [vmem:[%s3786_s25 + $0xc0] sm:$0xff] %vm216_vm0, %v3595_v0  ;;  %242 = vst.msk [vmem:[%s3786_s25 + $0xe8] sm:$0xff] %vm216_vm0, %v3595_v0 }
  0x82   : > { %247 = vst.msk [vmem:[%s3786_s25 + $0x110] sm:$0xff] %vm216_vm0, %v3595_v0  ;;  %252 = vst.msk [vmem:[%s3786_s25 + $0x138] sm:$0xff] %vm216_vm0, %v3595_v0 }
  0x83 PF: > { %p2425_p9 = scmp.le.s32.totalorder %s3782_s15, 0 }
  0x84   : > { %s2426_s21 = sshll.u32 (!%p2425_p9), %s3779_s26, 1  ;;  %v3841_v1 = vstv (!%p2425_p9), %s205_s20  ;;  %v406_v2 = vlaneseq (!%p2425_p9)  ;;  %v263_v6 = vld [vmem:[#allocation5 + $0x8] sm:$0xff] (!%p2425_p9)  ;;  %v265_v7 = vld [vmem:[#allocation5 + $0x18] sm:$0xff] (!%p2425_p9)  ;;  %v262_v12 = vld [vmem:[#allocation5] sm:$0xff] (!%p2425_p9)  ;;  %v3596_v22 = vmov (!%p2425_p9), 1.0|1.0  }
  0x85   : > { %256 = sbr.rel (%p2425_p9) target bundleno = 928 (0x3a0), region = 48  ;;  %s258_s29 = scalar_lea.vmem (!%p2425_p9), %s4695_s3, %s2426_s21  ;;  %v327_v10 = vld [vmem:[#allocation5 + $0x208] sm:$0xff] (!%p2425_p9)  ;;  %v329_v11 = vld [vmem:[#allocation5 + $0x218] sm:$0xff] (!%p2425_p9)  ;;  %v264_v14 = vld [vmem:[#allocation5 + $0x10] sm:$0xff] (!%p2425_p9) }
  0x86   : > { %v259_v3 = vld [vmem:[%s258_s29] sm:$0x3] (!%p2425_p9)  ;;  %v3846_v4 = vshrl.u32 (!%p2425_p9), %v406_v2, 7  ;;  %v326_v16 = vld [vmem:[#allocation5 + $0x200] sm:$0xff] (!%p2425_p9)  ;;  %v328_v17 = vld [vmem:[#allocation5 + $0x210] sm:$0xff] (!%p2425_p9)  ;;  %s3012_s30 = sshll.u32 (!%p2425_p9), %s3779_s26, 7 }
  0x87   : > { %v261_v5 = vsub.s32 (!%p2425_p9), %v259_v3, %v3841_v1  ;;  %v267_v18 = vld [vmem:[#allocation5 + $0x28] sm:$0xff] (!%p2425_p9)  ;;  %v269_v19 = vld [vmem:[#allocation5 + $0x38] sm:$0xff] (!%p2425_p9)  ;;  %v266_v23 = vld [vmem:[#allocation5 + $0x20] sm:$0xff] (!%p2425_p9)  ;;  %s3955_s6 = scalar_lea.vmem (!%p2425_p9), [#allocation8], %s3012_s30  ;;  %p2717_p2 = scmp.le.s32.totalorder (!%p2425_p9), %s3782_s15, 1 }
  0x88   : > { %v412_v8 = vsub.s32 (!%p2425_p9), 1, %v3846_v4  ;;  %v408_v9 = vsub.s32 (!%p2425_p9), 0, %v3846_v4  ;;  %v331_v20 = vld [vmem:[#allocation5 + $0x228] sm:$0xff] (!%p2425_p9)  ;;  %v333_v21 = vld [vmem:[#allocation5 + $0x238] sm:$0xff] (!%p2425_p9)  ;;  %v268_v24 = vld [vmem:[#allocation5 + $0x30] sm:$0xff] (!%p2425_p9) }
  0x89   : > { %v330_v25 = vld [vmem:[#allocation5 + $0x220] sm:$0xff] (!%p2425_p9)  ;;  %v332_v26 = vld [vmem:[#allocation5 + $0x230] sm:$0xff] (!%p2425_p9)  ;;  %v271_v27 = vld [vmem:[#allocation5 + $0x48] sm:$0xff] (!%p2425_p9) }
  0x8a   : > { %v3853_v13 = vrot.slane (!%p2425_p9), %v261_v5, %v412_v8  ;;  %v3857_v15 = vrot.slane (!%p2425_p9), %v261_v5, %v408_v9  ;;  %v273_v28 = vld [vmem:[#allocation5 + $0x58] sm:$0xff] (!%p2425_p9)  ;;  %v335_v29 = vld [vmem:[#allocation5 + $0x248] sm:$0xff] (!%p2425_p9)  ;;  %v270_v31 = vld [vmem:[#allocation5 + $0x40] sm:$0xff] (!%p2425_p9) }
  0x8b   : > { %v337_v30 = vld [vmem:[#allocation5 + $0x258] sm:$0xff] (!%p2425_p9)  ;;  %v272_v32 = vld [vmem:[#allocation5 + $0x50] sm:$0xff] (!%p2425_p9)  ;;  %v334_v33 = vld [vmem:[#allocation5 + $0x240] sm:$0xff] (!%p2425_p9) }
  0x8c   : > { %vm415_vm1 = vcmp.eq.s32.totalorder %v3853_v13, %v263_v6  ;;  %vm417_vm2 = vcmp.eq.s32.totalorder %v3853_v13, %v265_v7  ;;  %vm479_vm3 = vcmp.eq.s32.totalorder %v3853_v13, %v327_v10  ;;  %vm481_vm4 = vcmp.eq.s32.totalorder %v3853_v13, %v329_v11  ;;  %v336_v34 = vld [vmem:[#allocation5 + $0x250] sm:$0xff]  ;;  %v275_v35 = vld [vmem:[#allocation5 + $0x68] sm:$0xff]  ;;  %v277_v36 = vld [vmem:[#allocation5 + $0x78] sm:$0xff]  ;;  %s4215_s7 = smov (!%p2717_p2), 1  }
  0x8d   : > { %vm3014_vm5 = vmpackc.low %vm417_vm2, %vm415_vm1  ;;  %vm414_vm6 = vcmp.eq.s32.totalorder %v3857_v15, %v262_v12  ;;  %vm416_vm7 = vcmp.eq.s32.totalorder %v3857_v15, %v264_v14  ;;  %vm478_vm8 = vcmp.eq.s32.totalorder %v3857_v15, %v326_v16  ;;  %vm480_vm9 = vcmp.eq.s32.totalorder %v3857_v15, %v328_v17  ;;  %v339_v37 = vld [vmem:[#allocation5 + $0x268] sm:$0xff]  ;;  %v341_v38 = vld [vmem:[#allocation5 + $0x278] sm:$0xff] }
  0x8e   : > { %3015 = vmatprep.subr.msk.bf16.mxu0 %vm3014_vm5, %v3596_v22  ;;  %vm3078_vm10 = vmpackc.low %vm481_vm4, %vm479_vm3  ;;  %vm419_vm11 = vcmp.eq.s32.totalorder %v3853_v13, %v267_v18  ;;  %vm421_vm12 = vcmp.eq.s32.totalorder %v3853_v13, %v269_v19  ;;  %vm483_vm14 = vcmp.eq.s32.totalorder %v3853_v13, %v331_v20  ;;  %vm485_vm15 = vcmp.eq.s32.totalorder %v3853_v13, %v333_v21  ;;  %v274_v39 = vld [vmem:[#allocation5 + $0x60] sm:$0xff]  ;;  %v276_v40 = vld [vmem:[#allocation5 + $0x70] sm:$0xff] }
  0x8f   : > { %3079 = vmatprep.subr.msk.bf16.mxu1 %vm3078_vm10, %v3596_v22  ;;  %vm3016_vm13 = vmpackc.low %vm416_vm7, %vm414_vm6  ;;  %vm418_vm2 = vcmp.eq.s32.totalorder %v3857_v15, %v266_v23  ;;  %vm420_vm3 = vcmp.eq.s32.totalorder %v3857_v15, %v268_v24  ;;  %vm482_vm5 = vcmp.eq.s32.totalorder %v3857_v15, %v330_v25  ;;  %vm484_vm6 = vcmp.eq.s32.totalorder %v3857_v15, %v332_v26  ;;  %v338_v41 = vld [vmem:[#allocation5 + $0x260] sm:$0xff]  ;;  %v340_v42 = vld [vmem:[#allocation5 + $0x270] sm:$0xff] }
  0x90   : > { %3017 = vmatpush1.bf16.xpose.msk.msra.mxu0 %vm3016_vm13, %v3596_v22  ;;  %vm3080_vm0 = vmpackc.low %vm480_vm9, %vm478_vm8  ;;  %vm423_vm7 = vcmp.eq.s32.totalorder %v3853_v13, %v271_v27  ;;  %vm425_vm8 = vcmp.eq.s32.totalorder %v3853_v13, %v273_v28  ;;  %vm487_vm10 = vcmp.eq.s32.totalorder %v3853_v13, %v335_v29  ;;  %v279_v43 = vld [vmem:[#allocation5 + $0x88] sm:$0xff]  ;;  %v281_v44 = vld [vmem:[#allocation5 + $0x98] sm:$0xff] }
  0x91   : > { %3081 = vmatpush1.bf16.xpose.msk.msra.mxu1 %vm3080_vm0, %v3596_v22  ;;  %vm3018_vm1 = vmpackc.low %vm421_vm12, %vm419_vm11  ;;  %vm489_vm11 = vcmp.eq.s32.totalorder %v3853_v13, %v337_v30  ;;  %vm424_vm0 = vcmp.eq.s32.totalorder %v3857_v15, %v272_v32  ;;  %v343_v45 = vld [vmem:[#allocation5 + $0x288] sm:$0xff]  ;;  %v345_v46 = vld [vmem:[#allocation5 + $0x298] sm:$0xff] }
  0x92   : > { %3019 = vmatprep.subr.msk.bf16.mxu0 %vm3018_vm1, %v3596_v22  ;;  %vm3082_vm4 = vmpackc.low %vm485_vm15, %vm483_vm14  ;;  %vm422_vm15 = vcmp.eq.s32.totalorder %v3857_v15, %v270_v31  ;;  %vm486_vm1 = vcmp.eq.s32.totalorder %v3857_v15, %v334_v33  ;;  %v278_v47 = vld [vmem:[#allocation5 + $0x80] sm:$0xff]  ;;  %v280_v48 = vld [vmem:[#allocation5 + $0x90] sm:$0xff] }
  0x93   : > { %3083 = vmatprep.subr.msk.bf16.mxu1 %vm3082_vm4, %v3596_v22  ;;  %vm3020_vm9 = vmpackc.low %vm420_vm3, %vm418_vm2  ;;  %vm488_vm2 = vcmp.eq.s32.totalorder %v3857_v15, %v336_v34  ;;  %vm427_vm3 = vcmp.eq.s32.totalorder %v3853_v13, %v275_v35  ;;  %vm429_vm4 = vcmp.eq.s32.totalorder %v3853_v13, %v277_v36  ;;  %v342_v49 = vld [vmem:[#allocation5 + $0x280] sm:$0xff]  ;;  %v344_v50 = vld [vmem:[#allocation5 + $0x290] sm:$0xff] }
  0x94   : > { %vm3084_vm12 = vmpackc.low %vm484_vm6, %vm482_vm5  ;;  %vm491_vm6 = vcmp.eq.s32.totalorder %v3853_v13, %v339_v37  ;;  %v283_v51 = vld [vmem:[#allocation5 + $0xa8] sm:$0xff]  ;;  %v285_v52 = vld [vmem:[#allocation5 + $0xb8] sm:$0xff] }
  0x95   : > { %vm3022_vm13 = vmpackc.low %vm425_vm8, %vm423_vm7  ;;  %vm493_vm7 = vcmp.eq.s32.totalorder %v3853_v13, %v341_v38  ;;  %v347_v53 = vld [vmem:[#allocation5 + $0x2a8] sm:$0xff]  ;;  %v349_v54 = vld [vmem:[#allocation5 + $0x2b8] sm:$0xff] }
  0x96   : > { %vm3086_vm14 = vmpackc.low %vm489_vm11, %vm487_vm10  ;;  %vm426_vm11 = vcmp.eq.s32.totalorder %v3857_v15, %v274_v39  ;;  %v282_v55 = vld [vmem:[#allocation5 + $0xa0] sm:$0xff]  ;;  %v284_v56 = vld [vmem:[#allocation5 + $0xb0] sm:$0xff] }
  0x97   : > { %vm3024_vm5 = vmpackc.low %vm424_vm0, %vm422_vm15  ;;  %vm431_vm15 = vcmp.eq.s32.totalorder %v3853_v13, %v279_v43  ;;  %vm433_vm0 = vcmp.eq.s32.totalorder %v3853_v13, %v281_v44  ;;  %v346_v57 = vld [vmem:[#allocation5 + $0x2a0] sm:$0xff]  ;;  %v348_v58 = vld [vmem:[#allocation5 + $0x2b0] sm:$0xff] }
  0x98   : > { %3021 = vmatpush1.bf16.xpose.msk.msra.mxu0 %vm3020_vm9, %v3596_v22  ;;  %vm3088_vm8 = vmpackc.low %vm488_vm2, %vm486_vm1  ;;  %vm495_vm2 = vcmp.eq.s32.totalorder %v3853_v13, %v343_v45  ;;  %v287_v59 = vld [vmem:[#allocation5 + $0xc8] sm:$0xff]  ;;  %v289_v60 = vld [vmem:[#allocation5 + $0xd8] sm:$0xff] }
  0x99   : > { %3085 = vmatpush1.bf16.xpose.msk.msra.mxu1 %vm3084_vm12, %v3596_v22  ;;  %3023 = vmatprep.subr.msk.bf16.mxu0 %vm3022_vm13, %v3596_v22  ;;  %vm3026_vm9 = vmpackc.low %vm429_vm4, %vm427_vm3  ;;  %vm428_vm12 = vcmp.eq.s32.totalorder %v3857_v15, %v276_v40  ;;  %vm490_vm13 = vcmp.eq.s32.totalorder %v3857_v15, %v338_v41  ;;  %vm497_vm3 = vcmp.eq.s32.totalorder %v3853_v13, %v345_v46  ;;  %v351_v61 = vld [vmem:[#allocation5 + $0x2c8] sm:$0xff]  ;;  %v353_v62 = vld [vmem:[#allocation5 + $0x2d8] sm:$0xff] }
  0x9a   : > { %3087 = vmatprep.subr.msk.bf16.mxu1 %vm3086_vm14, %v3596_v22  ;;  %vm3090_vm10 = vmpackc.low %vm493_vm7, %vm491_vm6  ;;  %vm492_vm14 = vcmp.eq.s32.totalorder %v3857_v15, %v340_v42  ;;  %vm430_vm7 = vcmp.eq.s32.totalorder %v3857_v15, %v278_v47  ;;  %v286_v63 = vld [vmem:[#allocation5 + $0xc0] sm:$0xff]  ;;  %v288_v0 = vld [vmem:[#allocation5 + $0xd0] sm:$0xff] }
  0x9b   : > { %vm3028_vm1 = vmpackc.low %vm428_vm12, %vm426_vm11  ;;  %vm435_vm11 = vcmp.eq.s32.totalorder %v3853_v13, %v283_v51  ;;  %vm437_vm12 = vcmp.eq.s32.totalorder %v3853_v13, %v285_v52  ;;  %v350_v2 = vld [vmem:[#allocation5 + $0x2c0] sm:$0xff]  ;;  %v352_v3 = vld [vmem:[#allocation5 + $0x2d0] sm:$0xff] }
  0x9c   : > { %vm3092_vm4 = vmpackc.low %vm492_vm14, %vm490_vm13  ;;  %vm499_vm14 = vcmp.eq.s32.totalorder %v3853_v13, %v347_v53  ;;  %v291_v5 = vld [vmem:[#allocation5 + $0xe8] sm:$0xff]  ;;  %v293_v6 = vld [vmem:[#allocation5 + $0xf8] sm:$0xff] }
  0x9d   : > { %vm3094_vm6 = vmpackc.low %vm497_vm3, %vm495_vm2  ;;  %vm434_vm3 = vcmp.eq.s32.totalorder %v3857_v15, %v282_v55  ;;  %v355_v7 = vld [vmem:[#allocation5 + $0x2e8] sm:$0xff]  ;;  %v357_v10 = vld [vmem:[#allocation5 + $0x2f8] sm:$0xff] }
  0x9e   : > { %v290_v11 = vld [vmem:[#allocation5 + $0xe0] sm:$0xff]  ;;  %v292_v12 = vld [vmem:[#allocation5 + $0xf0] sm:$0xff]  ;;  %v295_v17 = vld [vmem:[#allocation5 + $0x108] sm:$0xff] }
  0x9f   : > { %v354_v14 = vld [vmem:[#allocation5 + $0x2e0] sm:$0xff]  ;;  %v356_v16 = vld [vmem:[#allocation5 + $0x2f0] sm:$0xff]  ;;  %v297_v18 = vld [vmem:[#allocation5 + $0x118] sm:$0xff] }
  0xa0   : > { %3025 = vmatpush1.bf16.xpose.msk.msra.mxu0 %vm3024_vm5, %v3596_v22  ;;  %vm3030_vm5 = vmpackc.low %vm433_vm0, %vm431_vm15  ;;  %vm501_vm15 = vcmp.eq.s32.totalorder %v3853_v13, %v349_v54  ;;  %v3958_v19 = vld [vmem:[%s3955_s6 + $0x8] sm:$0xff]  ;;  %v359_v20 = vld [vmem:[#allocation5 + $0x308] sm:$0xff] }
  0xa1   : > { %3089 = vmatpush1.bf16.xpose.msk.msra.mxu1 %vm3088_vm8, %v3596_v22  ;;  %3027 = vmatprep.subr.msk.bf16.mxu0 %vm3026_vm9, %v3596_v22  ;;  %vm432_vm8 = vcmp.eq.s32.totalorder %v3857_v15, %v280_v48  ;;  %vm494_vm9 = vcmp.eq.s32.totalorder %v3857_v15, %v342_v49  ;;  %vm3098_vm2 = vmpackc.low %vm501_vm15, %vm499_vm14  ;;  %vm438_vm15 = vcmp.eq.s32.totalorder %v3857_v15, %v286_v63  ;;  %v361_v21 = vld [vmem:[#allocation5 + $0x318] sm:$0xff]  ;;  %v294_v23 = vld [vmem:[#allocation5 + $0x100] sm:$0xff] }
  0xa2   : > { %3091 = vmatprep.subr.msk.bf16.mxu1 %vm3090_vm10, %v3596_v22  ;;  %vm496_vm10 = vcmp.eq.s32.totalorder %v3857_v15, %v344_v50  ;;  %vm3032_vm13 = vmpackc.low %vm432_vm8, %vm430_vm7  ;;  %vm439_vm7 = vcmp.eq.s32.totalorder %v3853_v13, %v287_v59  ;;  %vm441_vm8 = vcmp.eq.s32.totalorder %v3853_v13, %v289_v60  ;;  %929 = vmatprep.mubr.f32.mxu0 %v3958_v19  ;;  %v296_v24 = vld [vmem:[#allocation5 + $0x110] sm:$0xff]  ;;  %v358_v25 = vld [vmem:[#allocation5 + $0x300] sm:$0xff] }
  0xa3   : > { %vm3096_vm0 = vmpackc.low %vm496_vm10, %vm494_vm9  ;;  %vm503_vm10 = vcmp.eq.s32.totalorder %v3853_v13, %v351_v61  ;;  %1042 = vmatprep.mubr.f32.mxu1 %v3958_v19  ;;  %v360_v26 = vld [vmem:[#allocation5 + $0x310] sm:$0xff]  ;;  %v299_v27 = vld [vmem:[#allocation5 + $0x128] sm:$0xff] }
  0xa4   : > { %v301_v28 = vld [vmem:[#allocation5 + $0x138] sm:$0xff]  ;;  %v363_v29 = vld [vmem:[#allocation5 + $0x328] sm:$0xff]  ;;  %v298_v31 = vld [vmem:[#allocation5 + $0x120] sm:$0xff] }
  0xa5   : > { %v365_v30 = vld [vmem:[#allocation5 + $0x338] sm:$0xff]  ;;  %v300_v32 = vld [vmem:[#allocation5 + $0x130] sm:$0xff]  ;;  %v362_v33 = vld [vmem:[#allocation5 + $0x320] sm:$0xff] }
  0xa6   : > { %v364_v34 = vld [vmem:[#allocation5 + $0x330] sm:$0xff]  ;;  %v303_v35 = vld [vmem:[#allocation5 + $0x148] sm:$0xff]  ;;  %v305_v36 = vld [vmem:[#allocation5 + $0x158] sm:$0xff] }
  0xa7   : > { %v367_v37 = vld [vmem:[#allocation5 + $0x348] sm:$0xff]  ;;  %v369_v38 = vld [vmem:[#allocation5 + $0x358] sm:$0xff]  ;;  %v302_v39 = vld [vmem:[#allocation5 + $0x140] sm:$0xff] }
  0xa8   : > { %3029 = vmatpush1.bf16.xpose.msk.msra.mxu0 %vm3028_vm1, %v3596_v22  ;;  %vm3034_vm1 = vmpackc.low %vm437_vm12, %vm435_vm11  ;;  %vm505_vm11 = vcmp.eq.s32.totalorder %v3853_v13, %v353_v62  ;;  %v304_v40 = vld [vmem:[#allocation5 + $0x150] sm:$0xff]  ;;  %v366_v41 = vld [vmem:[#allocation5 + $0x340] sm:$0xff] }
  0xa9   : > { %3093 = vmatpush1.bf16.xpose.msk.msra.mxu1 %vm3092_vm4, %v3596_v22  ;;  %3031 = vmatprep.subr.msk.bf16.mxu0 %vm3030_vm5, %v3596_v22  ;;  %vm436_vm4 = vcmp.eq.s32.totalorder %v3857_v15, %v284_v56  ;;  %vm498_vm5 = vcmp.eq.s32.totalorder %v3857_v15, %v346_v57  ;;  %vm3102_vm14 = vmpackc.low %vm505_vm11, %vm503_vm10  ;;  %vm442_vm11 = vcmp.eq.s32.totalorder %v3857_v15, %v290_v11  ;;  %v368_v42 = vld [vmem:[#allocation5 + $0x350] sm:$0xff]  ;;  %v307_v43 = vld [vmem:[#allocation5 + $0x168] sm:$0xff] }
  0xaa   : > { %3095 = vmatprep.subr.msk.bf16.mxu1 %vm3094_vm6, %v3596_v22  ;;  %vm500_vm6 = vcmp.eq.s32.totalorder %v3857_v15, %v348_v58  ;;  %vm3036_vm9 = vmpackc.low %vm436_vm4, %vm434_vm3  ;;  %vm443_vm3 = vcmp.eq.s32.totalorder %v3853_v13, %v291_v5  ;;  %vm445_vm4 = vcmp.eq.s32.totalorder %v3853_v13, %v293_v6  ;;  %v309_v44 = vld [vmem:[#allocation5 + $0x178] sm:$0xff]  ;;  %v371_v45 = vld [vmem:[#allocation5 + $0x368] sm:$0xff] }
  0xab   : > { %vm3100_vm12 = vmpackc.low %vm500_vm6, %vm498_vm5  ;;  %vm507_vm6 = vcmp.eq.s32.totalorder %v3853_v13, %v355_v7  ;;  %v373_v46 = vld [vmem:[#allocation5 + $0x378] sm:$0xff]  ;;  %v306_v47 = vld [vmem:[#allocation5 + $0x160] sm:$0xff] }
  0xac   : > { %v308_v48 = vld [vmem:[#allocation5 + $0x170] sm:$0xff]  ;;  %v370_v49 = vld [vmem:[#allocation5 + $0x360] sm:$0xff]  ;;  %v311_v51 = vld [vmem:[#allocation5 + $0x188] sm:$0xff] }
  0xad   : > { %v372_v50 = vld [vmem:[#allocation5 + $0x370] sm:$0xff]  ;;  %v313_v52 = vld [vmem:[#allocation5 + $0x198] sm:$0xff]  ;;  %v375_v53 = vld [vmem:[#allocation5 + $0x388] sm:$0xff] }
  0xae   : > { %v377_v54 = vld [vmem:[#allocation5 + $0x398] sm:$0xff]  ;;  %v310_v55 = vld [vmem:[#allocation5 + $0x180] sm:$0xff]  ;;  %v312_v56 = vld [vmem:[#allocation5 + $0x190] sm:$0xff] }
  0xaf   : > { %v374_v57 = vld [vmem:[#allocation5 + $0x380] sm:$0xff]  ;;  %v376_v58 = vld [vmem:[#allocation5 + $0x390] sm:$0xff]  ;;  %v315_v59 = vld [vmem:[#allocation5 + $0x1a8] sm:$0xff] }
  0xb0   : > { %3033 = vmatpush1.bf16.xpose.msk.msra.mxu0 %vm3032_vm13, %v3596_v22  ;;  %vm3038_vm13 = vmpackc.low %vm441_vm8, %vm439_vm7  ;;  %vm509_vm7 = vcmp.eq.s32.totalorder %v3853_v13, %v357_v10  ;;  %v317_v60 = vld [vmem:[#allocation5 + $0x1b8] sm:$0xff]  ;;  %v379_v61 = vld [vmem:[#allocation5 + $0x3a8] sm:$0xff] }
  0xb1   : > { %3097 = vmatpush1.bf16.xpose.msk.msra.mxu1 %vm3096_vm0, %v3596_v22  ;;  %3035 = vmatprep.subr.msk.bf16.mxu0 %vm3034_vm1, %v3596_v22  ;;  %vm440_vm0 = vcmp.eq.s32.totalorder %v3857_v15, %v288_v0  ;;  %vm502_vm1 = vcmp.eq.s32.totalorder %v3857_v15, %v350_v2  ;;  %vm3106_vm10 = vmpackc.low %vm509_vm7, %vm507_vm6  ;;  %vm446_vm7 = vcmp.eq.s32.totalorder %v3857_v15, %v294_v23  ;;  %v381_v62 = vld [vmem:[#allocation5 + $0x3b8] sm:$0xff]  ;;  %v314_v63 = vld [vmem:[#allocation5 + $0x1a0] sm:$0xff] }
  0xb2   : > { %3099 = vmatprep.subr.msk.bf16.mxu1 %vm3098_vm2, %v3596_v22  ;;  %vm504_vm2 = vcmp.eq.s32.totalorder %v3857_v15, %v352_v3  ;;  %vm3040_vm5 = vmpackc.low %vm440_vm0, %vm438_vm15  ;;  %vm447_vm15 = vcmp.eq.s32.totalorder %v3853_v13, %v295_v17  ;;  %vm449_vm0 = vcmp.eq.s32.totalorder %v3853_v13, %v297_v18  ;;  %v316_v0 = vld [vmem:[#allocation5 + $0x1b0] sm:$0xff]  ;;  %v378_v2 = vld [vmem:[#allocation5 + $0x3a0] sm:$0xff] }
  0xb3   : > { %vm3104_vm8 = vmpackc.low %vm504_vm2, %vm502_vm1  ;;  %vm511_vm2 = vcmp.eq.s32.totalorder %v3853_v13, %v359_v20  ;;  %v380_v3 = vld [vmem:[#allocation5 + $0x3b0] sm:$0xff]  ;;  %v319_v5 = vld [vmem:[#allocation5 + $0x1c8] sm:$0xff] }
  0xb4   : > { %v321_v6 = vld [vmem:[#allocation5 + $0x1d8] sm:$0xff]  ;;  %v383_v7 = vld [vmem:[#allocation5 + $0x3c8] sm:$0xff]  ;;  %v318_v11 = vld [vmem:[#allocation5 + $0x1c0] sm:$0xff] }
  0xb5   : > { %v385_v10 = vld [vmem:[#allocation5 + $0x3d8] sm:$0xff]  ;;  %v323_v17 = vld [vmem:[#allocation5 + $0x1e8] sm:$0xff]  ;;  %v322_v23 = vld [vmem:[#allocation5 + $0x1e0] sm:$0xff] }
  0xb6   : > { %v325_v18 = vld [vmem:[#allocation5 + $0x1f8] sm:$0xff]  ;;  %v387_v20 = vld [vmem:[#allocation5 + $0x3e8] sm:$0xff] }
  0xb8   : > { %3037 = vmatpush1.bf16.xpose.msk.msra.mxu0 %vm3036_vm9, %v3596_v22  ;;  %vm3042_vm9 = vmpackc.low %vm445_vm4, %vm443_vm3  ;;  %vm513_vm3 = vcmp.eq.s32.totalorder %v3853_v13, %v361_v21  ;;  %v389_v21 = vld [vmem:[#allocation5 + $0x3f8] sm:$0xff] }
  0xb9   : > { %3101 = vmatpush1.bf16.xpose.msk.msra.mxu1 %vm3100_vm12, %v3596_v22  ;;  %3039 = vmatprep.subr.msk.bf16.mxu0 %vm3038_vm13, %v3596_v22  ;;  %vm444_vm12 = vcmp.eq.s32.totalorder %v3857_v15, %v292_v12  ;;  %vm506_vm13 = vcmp.eq.s32.totalorder %v3857_v15, %v354_v14  ;;  %vm3110_vm6 = vmpackc.low %vm513_vm3, %vm511_vm2  ;;  %vm450_vm3 = vcmp.eq.s32.totalorder %v3857_v15, %v298_v31  ;;  %v320_v12 = vld [vmem:[#allocation5 + $0x1d0] sm:$0xff]  ;;  %v382_v14 = vld [vmem:[#allocation5 + $0x3c0] sm:$0xff] }
  0xba   : > { %3103 = vmatprep.subr.msk.bf16.mxu1 %vm3102_vm14, %v3596_v22  ;;  %vm508_vm14 = vcmp.eq.s32.totalorder %v3857_v15, %v356_v16  ;;  %vm3044_vm1 = vmpackc.low %vm444_vm12, %vm442_vm11  ;;  %vm451_vm11 = vcmp.eq.s32.totalorder %v3853_v13, %v299_v27  ;;  %vm453_vm12 = vcmp.eq.s32.totalorder %v3853_v13, %v301_v28  ;;  %v384_v16 = vld [vmem:[#allocation5 + $0x3d0] sm:$0xff]  ;;  %v391_v27 = vld [vmem:[#allocation5 + $0x408] sm:$0xff] }
  0xbb   : > { %vm3108_vm4 = vmpackc.low %vm508_vm14, %vm506_vm13  ;;  %vm515_vm14 = vcmp.eq.s32.totalorder %v3853_v13, %v363_v29  ;;  %v393_v28 = vld [vmem:[#allocation5 + $0x418] sm:$0xff]  ;;  %v390_v29 = vld [vmem:[#allocation5 + $0x400] sm:$0xff] }
  0xbc   : > { %v395_v31 = vld [vmem:[#allocation5 + $0x428] sm:$0xff] }
  0xc0   : > { %3041 = vmatpush1.bf16.xpose.msk.msra.mxu0 %vm3040_vm5, %v3596_v22  ;;  %vm3046_vm5 = vmpackc.low %vm449_vm0, %vm447_vm15  ;;  %vm517_vm15 = vcmp.eq.s32.totalorder %v3853_v13, %v365_v30  ;;  %v392_v30 = vld [vmem:[#allocation5 + $0x410] sm:$0xff] }
  0xc1   : > { %3105 = vmatpush1.bf16.xpose.msk.msra.mxu1 %vm3104_vm8, %v3596_v22  ;;  %3043 = vmatprep.subr.msk.bf16.mxu0 %vm3042_vm9, %v3596_v22  ;;  %vm448_vm8 = vcmp.eq.s32.totalorder %v3857_v15, %v296_v24  ;;  %vm510_vm9 = vcmp.eq.s32.totalorder %v3857_v15, %v358_v25  ;;  %vm3114_vm2 = vmpackc.low %vm517_vm15, %vm515_vm14  ;;  %vm454_vm15 = vcmp.eq.s32.totalorder %v3857_v15, %v302_v39  ;;  %v324_v24 = vld [vmem:[#allocation5 + $0x1f0] sm:$0xff]  ;;  %v386_v25 = vld [vmem:[#allocation5 + $0x3e0] sm:$0xff] }
  0xc2   : > { %3107 = vmatprep.subr.msk.bf16.mxu1 %vm3106_vm10, %v3596_v22  ;;  %vm512_vm10 = vcmp.eq.s32.totalorder %v3857_v15, %v360_v26  ;;  %vm3048_vm13 = vmpackc.low %vm448_vm8, %vm446_vm7  ;;  %vm455_vm7 = vcmp.eq.s32.totalorder %v3853_v13, %v303_v35  ;;  %vm457_vm8 = vcmp.eq.s32.totalorder %v3853_v13, %v305_v36  ;;  %v388_v26 = vld [vmem:[#allocation5 + $0x3f0] sm:$0xff]  ;;  %v394_v36 = vld [vmem:[#allocation5 + $0x420] sm:$0xff] }
  0xc3   : > { %vm3112_vm0 = vmpackc.low %vm512_vm10, %vm510_vm9  ;;  %vm519_vm10 = vcmp.eq.s32.totalorder %v3853_v13, %v367_v37  ;;  %v396_v37 = vld [vmem:[#allocation5 + $0x430] sm:$0xff]  ;;  %v4094_v39 = vld [vmem:[%s3955_s6 + $0x28] sm:$0xff] }
  0xc8   : > { %3045 = vmatpush1.bf16.xpose.msk.msra.mxu0 %vm3044_vm1, %v3596_v22  ;;  %vm3050_vm1 = vmpackc.low %vm453_vm12, %vm451_vm11  ;;  %vm521_vm11 = vcmp.eq.s32.totalorder %v3853_v13, %v369_v38  ;;  %v4089_v38 = vld [vmem:[%s3955_s6 + $0x10] sm:$0xff] }
  0xc9   : > { %3109 = vmatpush1.bf16.xpose.msk.msra.mxu1 %vm3108_vm4, %v3596_v22  ;;  %3047 = vmatprep.subr.msk.bf16.mxu0 %vm3046_vm5, %v3596_v22  ;;  %vm452_vm4 = vcmp.eq.s32.totalorder %v3857_v15, %v300_v32  ;;  %vm514_vm5 = vcmp.eq.s32.totalorder %v3857_v15, %v362_v33  ;;  %vm3118_vm14 = vmpackc.low %vm521_vm11, %vm519_vm10  ;;  %vm458_vm11 = vcmp.eq.s32.totalorder %v3857_v15, %v306_v47  ;;  %v397_v32 = vld [vmem:[#allocation5 + $0x438] sm:$0xff]  ;;  %v4125_v47 = vld [vmem:[%s3955_s6 + $0x30] sm:$0xff] }
  0xca   : > { %3111 = vmatprep.subr.msk.bf16.mxu1 %vm3110_vm6, %v3596_v22  ;;  %vm516_vm6 = vcmp.eq.s32.totalorder %v3857_v15, %v364_v34  ;;  %vm3052_vm9 = vmpackc.low %vm452_vm4, %vm450_vm3  ;;  %vm459_vm3 = vcmp.eq.s32.totalorder %v3853_v13, %v307_v43  ;;  %vm461_vm4 = vcmp.eq.s32.totalorder %v3853_v13, %v309_v44  ;;  %v4074_v33 = vld [vmem:[%s3955_s6] sm:$0xff]  ;;  %v4079_v34 = vld [vmem:[%s3955_s6 + $0x18] sm:$0xff] }
  0xcb   : > { %vm3116_vm12 = vmpackc.low %vm516_vm6, %vm514_vm5  ;;  %vm523_vm6 = vcmp.eq.s32.totalorder %v3853_v13, %v371_v45  ;;  %v4115_v43 = vld [vmem:[%s3955_s6 + $0x38] sm:$0xff]  ;;  %v398_v45 = vld [vmem:[#allocation5 + $0x440] sm:$0xff] }
  0xd0   : > { %3049 = vmatpush1.bf16.xpose.msk.msra.mxu0 %vm3048_vm13, %v3596_v22  ;;  %vm3054_vm13 = vmpackc.low %vm457_vm8, %vm455_vm7  ;;  %vm525_vm7 = vcmp.eq.s32.totalorder %v3853_v13, %v373_v46  ;;  %v400_v46 = vld [vmem:[#allocation5 + $0x450] sm:$0xff] }
  0xd1   : > { %3113 = vmatpush1.bf16.xpose.msk.msra.mxu1 %vm3112_vm0, %v3596_v22  ;;  %3051 = vmatprep.subr.msk.bf16.mxu0 %vm3050_vm1, %v3596_v22  ;;  %vm456_vm0 = vcmp.eq.s32.totalorder %v3857_v15, %v304_v40  ;;  %vm518_vm1 = vcmp.eq.s32.totalorder %v3857_v15, %v366_v41  ;;  %vm3122_vm10 = vmpackc.low %vm525_vm7, %vm523_vm6  ;;  %vm462_vm7 = vcmp.eq.s32.totalorder %v3857_v15, %v310_v55  ;;  %v399_v40 = vld [vmem:[#allocation5 + $0x448] sm:$0xff]  ;;  %v401_v41 = vld [vmem:[#allocation5 + $0x458] sm:$0xff] }
  0xd2   : > { %3115 = vmatprep.subr.msk.bf16.mxu1 %vm3114_vm2, %v3596_v22  ;;  %vm520_vm2 = vcmp.eq.s32.totalorder %v3857_v15, %v368_v42  ;;  %vm3056_vm5 = vmpackc.low %vm456_vm0, %vm454_vm15  ;;  %vm463_vm15 = vcmp.eq.s32.totalorder %v3853_v13, %v311_v51  ;;  %vm465_vm0 = vcmp.eq.s32.totalorder %v3853_v13, %v313_v52  ;;  %v4109_v42 = vld [vmem:[%s3955_s6 + $0x20] sm:$0xff]  ;;  %v860_v52 = vld [vmem:[%s3955_s6 + $0x58] sm:$0xff] }
  0xd3   : > { %vm3120_vm8 = vmpackc.low %vm520_vm2, %vm518_vm1  ;;  %vm527_vm2 = vcmp.eq.s32.totalorder %v3853_v13, %v375_v53  ;;  %v857_v51 = vld [vmem:[%s3955_s6 + $0x40] sm:$0xff]  ;;  %v402_v53 = vld [vmem:[#allocation5 + $0x460] sm:$0xff] }
  0xd4   : > { %v859_v55 = vld [vmem:[%s3955_s6 + $0x50] sm:$0xff] }
  0xd8   : > { %3053 = vmatpush1.bf16.xpose.msk.msra.mxu0 %vm3052_vm9, %v3596_v22  ;;  %vm3058_vm9 = vmpackc.low %vm461_vm4, %vm459_vm3  ;;  %vm529_vm3 = vcmp.eq.s32.totalorder %v3853_v13, %v377_v54  ;;  %v404_v54 = vld [vmem:[#allocation5 + $0x470] sm:$0xff] }
  0xd9   : > { %3117 = vmatpush1.bf16.xpose.msk.msra.mxu1 %vm3116_vm12, %v3596_v22  ;;  %3055 = vmatprep.subr.msk.bf16.mxu0 %vm3054_vm13, %v3596_v22  ;;  %vm460_vm12 = vcmp.eq.s32.totalorder %v3857_v15, %v308_v48  ;;  %vm522_vm13 = vcmp.eq.s32.totalorder %v3857_v15, %v370_v49  ;;  %vm3126_vm6 = vmpackc.low %vm529_vm3, %vm527_vm2  ;;  %vm466_vm3 = vcmp.eq.s32.totalorder %v3857_v15, %v314_v63  ;;  %v858_v48 = vld [vmem:[%s3955_s6 + $0x48] sm:$0xff]  ;;  %v403_v49 = vld [vmem:[#allocation5 + $0x468] sm:$0xff] }
  0xda   : > { %3119 = vmatprep.subr.msk.bf16.mxu1 %vm3118_vm14, %v3596_v22  ;;  %vm524_vm14 = vcmp.eq.s32.totalorder %v3857_v15, %v372_v50  ;;  %vm3060_vm1 = vmpackc.low %vm460_vm12, %vm458_vm11  ;;  %vm467_vm11 = vcmp.eq.s32.totalorder %v3853_v13, %v315_v59  ;;  %vm469_vm12 = vcmp.eq.s32.totalorder %v3853_v13, %v317_v60  ;;  %v405_v50 = vld [vmem:[#allocation5 + $0x478] sm:$0xff] }
  0xdb   : > { %vm3124_vm4 = vmpackc.low %vm524_vm14, %vm522_vm13  ;;  %vm531_vm14 = vcmp.eq.s32.totalorder %v3853_v13, %v379_v61 }
  0xe0   : > { %3057 = vmatpush1.bf16.xpose.msk.msra.mxu0 %vm3056_vm5, %v3596_v22  ;;  %vm3062_vm5 = vmpackc.low %vm465_vm0, %vm463_vm15  ;;  %vm533_vm15 = vcmp.eq.s32.totalorder %v3853_v13, %v381_v62 }
  0xe1   : > { %3121 = vmatpush1.bf16.xpose.msk.msra.mxu1 %vm3120_vm8, %v3596_v22  ;;  %3059 = vmatprep.subr.msk.bf16.mxu0 %vm3058_vm9, %v3596_v22  ;;  %vm464_vm8 = vcmp.eq.s32.totalorder %v3857_v15, %v312_v56  ;;  %vm526_vm9 = vcmp.eq.s32.totalorder %v3857_v15, %v374_v57  ;;  %vm3130_vm2 = vmpackc.low %vm533_vm15, %vm531_vm14  ;;  %vm470_vm15 = vcmp.eq.s32.totalorder %v3857_v15, %v318_v11  ;;  %v862_v56 = vld [vmem:[%s3955_s6 + $0x68] sm:$0xff]  ;;  %v864_v57 = vld [vmem:[%s3955_s6 + $0x78] sm:$0xff] }
  0xe2   : > { %3123 = vmatprep.subr.msk.bf16.mxu1 %vm3122_vm10, %v3596_v22  ;;  %vm528_vm10 = vcmp.eq.s32.totalorder %v3857_v15, %v376_v58  ;;  %vm3064_vm13 = vmpackc.low %vm464_vm8, %vm462_vm7  ;;  %vm471_vm7 = vcmp.eq.s32.totalorder %v3853_v13, %v319_v5  ;;  %vm473_vm8 = vcmp.eq.s32.totalorder %v3853_v13, %v321_v6  ;;  %v863_v58 = vld [vmem:[%s3955_s6 + $0x70] sm:$0xff] }
  0xe3   : > { %vm3128_vm0 = vmpackc.low %vm528_vm10, %vm526_vm9  ;;  %vm535_vm10 = vcmp.eq.s32.totalorder %v3853_v13, %v383_v7 }
  0xe8   : > { %3061 = vmatpush1.bf16.xpose.msk.msra.mxu0 %vm3060_vm1, %v3596_v22  ;;  %vm3066_vm1 = vmpackc.low %vm469_vm12, %vm467_vm11  ;;  %vm537_vm11 = vcmp.eq.s32.totalorder %v3853_v13, %v385_v10 }
  0xe9   : > { %3125 = vmatpush1.bf16.xpose.msk.msra.mxu1 %vm3124_vm4, %v3596_v22  ;;  %3063 = vmatprep.subr.msk.bf16.mxu0 %vm3062_vm5, %v3596_v22  ;;  %vm468_vm4 = vcmp.eq.s32.totalorder %v3857_v15, %v316_v0  ;;  %vm530_vm5 = vcmp.eq.s32.totalorder %v3857_v15, %v378_v2  ;;  %vm3134_vm14 = vmpackc.low %vm537_vm11, %vm535_vm10  ;;  %vm474_vm11 = vcmp.eq.s32.totalorder %v3857_v15, %v322_v23 }
  0xea   : > { %3127 = vmatprep.subr.msk.bf16.mxu1 %vm3126_vm6, %v3596_v22  ;;  %vm532_vm6 = vcmp.eq.s32.totalorder %v3857_v15, %v380_v3  ;;  %vm3068_vm9 = vmpackc.low %vm468_vm4, %vm466_vm3  ;;  %vm475_vm3 = vcmp.eq.s32.totalorder %v3853_v13, %v323_v17  ;;  %vm477_vm4 = vcmp.eq.s32.totalorder %v3853_v13, %v325_v18 }
  0xeb   : > { %vm3132_vm12 = vmpackc.low %vm532_vm6, %vm530_vm5  ;;  %vm539_vm6 = vcmp.eq.s32.totalorder %v3853_v13, %v387_v20 }
  0xf0   : > { %3065 = vmatpush1.bf16.xpose.msk.msra.mxu0 %vm3064_vm13, %v3596_v22  ;;  %vm3070_vm13 = vmpackc.low %vm473_vm8, %vm471_vm7  ;;  %vm541_vm7 = vcmp.eq.s32.totalorder %v3853_v13, %v389_v21 }
  0xf1   : > { %3129 = vmatpush1.bf16.xpose.msk.msra.mxu1 %vm3128_vm0, %v3596_v22  ;;  %3067 = vmatprep.subr.msk.bf16.mxu0 %vm3066_vm1, %v3596_v22  ;;  %vm472_vm0 = vcmp.eq.s32.totalorder %v3857_v15, %v320_v12  ;;  %vm534_vm1 = vcmp.eq.s32.totalorder %v3857_v15, %v382_v14  ;;  %vm3138_vm10 = vmpackc.low %vm541_vm7, %vm539_vm6  ;;  %vm547_vm6 = vcmp.eq.s32.totalorder %v3853_v13, %v395_v31 }
  0xf2   : > { %3131 = vmatprep.subr.msk.bf16.mxu1 %vm3130_vm2, %v3596_v22  ;;  %vm536_vm2 = vcmp.eq.s32.totalorder %v3857_v15, %v384_v16  ;;  %vm3072_vm5 = vmpackc.low %vm472_vm0, %vm470_vm15  ;;  %vm543_vm15 = vcmp.eq.s32.totalorder %v3853_v13, %v391_v27  ;;  %vm545_vm0 = vcmp.eq.s32.totalorder %v3853_v13, %v393_v28  ;;  %vm549_vm7 = vcmp.eq.s32.totalorder %v3853_v13, %v397_v32 }
  0xf3   : > { %vm3136_vm8 = vmpackc.low %vm536_vm2, %vm534_vm1 }
  0xf8   : > { %3069 = vmatpush1.bf16.xpose.msk.msra.mxu0 %vm3068_vm9, %v3596_v22  ;;  %vm3074_vm9 = vmpackc.low %vm477_vm4, %vm475_vm3  ;;  %vm542_vm4 = vcmp.eq.s32.totalorder %v3857_v15, %v390_v29 }
  0xf9   : > { %3133 = vmatpush1.bf16.xpose.msk.msra.mxu1 %vm3132_vm12, %v3596_v22  ;;  %3071 = vmatprep.subr.msk.bf16.mxu0 %vm3070_vm13, %v3596_v22  ;;  %vm476_vm12 = vcmp.eq.s32.totalorder %v3857_v15, %v324_v24  ;;  %vm538_vm13 = vcmp.eq.s32.totalorder %v3857_v15, %v386_v25  ;;  %vm3142_vm3 = vmpackc.low %vm545_vm0, %vm543_vm15  ;;  %vm550_vm0 = vcmp.eq.s32.totalorder %v3857_v15, %v398_v45 }
  0xfa   : > { %3135 = vmatprep.subr.msk.bf16.mxu1 %vm3134_vm14, %v3596_v22  ;;  %vm540_vm14 = vcmp.eq.s32.totalorder %v3857_v15, %v388_v26  ;;  %vm3076_vm1 = vmpackc.low %vm476_vm12, %vm474_vm11  ;;  %vm548_vm11 = vcmp.eq.s32.totalorder %v3857_v15, %v396_v37  ;;  %vm551_vm12 = vcmp.eq.s32.totalorder %v3853_v13, %v399_v40 }
  0xfb   : > { %vm3140_vm2 = vmpackc.low %vm540_vm14, %vm538_vm13  ;;  %vm553_vm13 = vcmp.eq.s32.totalorder %v3853_v13, %v401_v41 }
  0xfc   : > { %vm4118_vm15 = vmpackc.low %vm553_vm13, %vm551_vm12 }
 0x100   : > { %3073 = vmatpush1.bf16.xpose.msk.msra.mxu0 %vm3072_vm5, %v3596_v22  ;;  %vm544_vm5 = vcmp.eq.s32.totalorder %v3857_v15, %v392_v30 }
 0x101   : > { %3137 = vmatpush1.bf16.xpose.msk.msra.mxu1 %vm3136_vm8, %v3596_v22  ;;  %3075 = vmatprep.subr.msk.bf16.mxu0 %vm3074_vm9, %v3596_v22  ;;  %vm3144_vm8 = vmpackc.low %vm544_vm5, %vm542_vm4 }
 0x102   : > { %3139 = vmatprep.subr.msk.bf16.mxu1 %vm3138_vm10, %v3596_v22  ;;  %vm4082_vm9 = vmpackc.low %vm549_vm7, %vm547_vm6  ;;  %vm546_vm10 = vcmp.eq.s32.totalorder %v3857_v15, %v394_v36  ;;  %vm554_vm6 = vcmp.eq.s32.totalorder %v3857_v15, %v402_v53  ;;  %vm556_vm7 = vcmp.eq.s32.totalorder %v3857_v15, %v404_v54 }
 0x103   : > { %vm3148_vm14 = vmpackc.low %vm548_vm11, %vm546_vm10 }
 0x108   : > { %3077 = vmatpush1.bf16.xpose.msk.msra.mxu0 %vm3076_vm1, %v3596_v22  ;;  %vm552_vm1 = vcmp.eq.s32.totalorder %v3857_v15, %v400_v46 }
 0x109   : > { %3141 = vmatpush1.bf16.xpose.msk.msra.mxu1 %vm3140_vm2, %v3596_v22  ;;  %3143 = vmatprep.subr.msk.bf16.mxu0 %vm3142_vm3, %v3596_v22  ;;  %vm555_vm2 = vcmp.eq.s32.totalorder %v3853_v13, %v403_v49  ;;  %vm3152_vm4 = vmpackc.low %vm552_vm1, %vm550_vm0 }
 0x10a   : > { %3302 = vmatprep.subr.msk.bf16.mxu1 %vm3142_vm3, %v3596_v22  ;;  %vm557_vm3 = vcmp.eq.s32.totalorder %v3853_v13, %v405_v50  ;;  %v861_v13 = vld [vmem:[%s3955_s6 + $0x60] sm:$0xff] }
 0x10b   : > { %vm3154_vm5 = vmpackc.low %vm557_vm3, %vm555_vm2 }
 0x10f   : > { %930 = vmatmul.mubr.f32.vlgmr.msra.gmra.mrb[0].mxu0 %v4074_v33 }
 0x110   : > { %1043 = vmatmul.mubr.f32.vlgmr.msra.gmra.mrb[0].mxu1 %v4074_v33  ;;  %3145 = vmatpush1.bf16.xpose.msk.msra.mxu0 %vm3144_vm8, %v3596_v22 }
 0x111   : > { %3306 = vmatpush1.bf16.xpose.msk.msra.mxu1 %vm3144_vm8, %v3596_v22  ;;  %935 = vmatprep.mubr.f32.mxu0 %v4079_v34  ;;  %vm3156_vm8 = vmpackc.low %vm556_vm7, %vm554_vm6 }
 0x112   : > { %1048 = vmatprep.mubr.f32.mxu1 %v4079_v34  ;;  %3147 = vmatprep.subr.msk.bf16.mxu0 %vm4082_vm9, %v3596_v22 }
 0x113   : > { %936 = vmatmul.mubr.f32.gmra.mrb[2].mxu0 %v4089_v38  ;;  %3303 = vmatprep.subr.msk.bf16.mxu1 %vm4082_vm9, %v3596_v22  ;;  %vm1200_vm9 = vcmask 523264  }
 0x114   : > { %1049 = vmatmul.mubr.f32.gmra.mrb[2].mxu1 %v4089_v38  ;;  %941 = vmatprep.mubr.f32.mxu0 %v4094_v39 }
 0x115   : > { %1054 = vmatprep.mubr.f32.mxu1 %v4094_v39 }
 0x117   : > { %942 = vmatmul.mubr.f32.gmra.mrb[4].mxu0 %v4109_v42 }
 0x118   : > { %1055 = vmatmul.mubr.f32.gmra.mrb[4].mxu1 %v4109_v42  ;;  %3149 = vmatpush1.bf16.xpose.msk.msra.mxu0 %vm3148_vm14, %v3596_v22 }
 0x119   : > { %3307 = vmatpush1.bf16.xpose.msk.msra.mxu1 %vm3148_vm14, %v3596_v22  ;;  %947 = vmatprep.mubr.f32.mxu0 %v4115_v43 }
 0x11a   : > { %1060 = vmatprep.mubr.f32.mxu1 %v4115_v43  ;;  %3151 = vmatprep.subr.msk.bf16.mxu0 %vm4118_vm15, %v3596_v22 }
 0x11b   : > { %948 = vmatmul.mubr.f32.gmra.mrb[6].mxu0 %v4125_v47  ;;  %3304 = vmatprep.subr.msk.bf16.mxu1 %vm4118_vm15, %v3596_v22 }
 0x11c   : > { %1061 = vmatmul.mubr.f32.gmra.mrb[6].mxu1 %v4125_v47  ;;  %953 = vmatprep.mubr.f32.mxu0 %v858_v48 }
 0x11d   : > { %1066 = vmatprep.mubr.f32.mxu1 %v858_v48 }
 0x11f   : > { %954 = vmatmul.mubr.f32.gmra.mrb[8].mxu0 %v857_v51 }
 0x120   : > { %1067 = vmatmul.mubr.f32.gmra.mrb[8].mxu1 %v857_v51  ;;  %3153 = vmatpush1.bf16.xpose.msk.msra.mxu0 %vm3152_vm4, %v3596_v22 }
 0x121   : > { %3308 = vmatpush1.bf16.xpose.msk.msra.mxu1 %vm3152_vm4, %v3596_v22  ;;  %959 = vmatprep.mubr.f32.mxu0 %v860_v52 }
 0x122   : > { %1072 = vmatprep.mubr.f32.mxu1 %v860_v52  ;;  %3155 = vmatprep.subr.msk.bf16.mxu0 %vm3154_vm5, %v3596_v22 }
 0x123   : > { %960 = vmatmul.mubr.f32.gmra.mrb[10].mxu0 %v859_v55  ;;  %3305 = vmatprep.subr.msk.bf16.mxu1 %vm3154_vm5, %v3596_v22 }
 0x124   : > { %1073 = vmatmul.mubr.f32.gmra.mrb[10].mxu1 %v859_v55  ;;  %965 = vmatprep.mubr.f32.mxu0 %v862_v56 }
 0x125   : > { %1078 = vmatprep.mubr.f32.mxu1 %v862_v56 }
 0x127   : > { %966 = vmatmul.mubr.f32.gmra.mrb[12].mxu0 %v861_v13 }
 0x128   : > { %1079 = vmatmul.mubr.f32.gmra.mrb[12].mxu1 %v861_v13  ;;  %3157 = vmatpush1.bf16.xpose.msk.msra.mxu0 %vm3156_vm8, %v3596_v22 }
 0x129   : > { %3309 = vmatpush1.bf16.xpose.msk.msra.mxu1 %vm3156_vm8, %v3596_v22  ;;  %971 = vmatprep.mubr.f32.mxu0 %v864_v57 }
 0x12a   : > { %1084 = vmatprep.mubr.f32.mxu1 %v864_v57 }
 0x12b   : > { %972 = vmatmul.mubr.f32.gmra.mrb[14].mxu0 %v863_v58 }
 0x12c   : > { %1085 = vmatmul.mubr.f32.gmra.mrb[14].mxu1 %v863_v58  ;;  %1155 = vmatprep.mubr.f32.mxu0 %v3958_v19 }
 0x12d   : > { %1175 = vmatprep.mubr.f32.mxu1 %v858_v48 }
 0x12f   : > { %1156 = vmatmul.mubr.f32.vlgmr.msra.gmra.mrb[16].mxu0 %v4074_v33 }
 0x130   : > { %1176 = vmatmul.mubr.f32.vlgmr.msra.gmra.mrb[16].mxu1 %v857_v51  ;;  %1160 = vmatprep.mubr.f32.mxu0 %v4079_v34 }
 0x131   : > { %1180 = vmatprep.mubr.f32.mxu1 %v860_v52 }
 0x133   : > { %1161 = vmatmul.mubr.f32.gmra.mrb[18].mxu0 %v4089_v38 }
 0x134   : > { %1181 = vmatmul.mubr.f32.gmra.mrb[18].mxu1 %v859_v55  ;;  %1165 = vmatprep.mubr.f32.mxu0 %v4094_v39 }
 0x135   : > { %1185 = vmatprep.mubr.f32.mxu1 %v862_v56 }
 0x137   : > { %1166 = vmatmul.mubr.f32.gmra.mrb[20].mxu0 %v4109_v42 }
 0x138   : > { %1186 = vmatmul.mubr.f32.gmra.mrb[20].mxu1 %v861_v13  ;;  %1170 = vmatprep.mubr.f32.mxu0 %v4115_v43 }
 0x139   : > { %1190 = vmatprep.mubr.f32.mxu1 %v864_v57 }
 0x13b   : > { %1171 = vmatmul.mubr.f32.gmra.mrb[22].mxu0 %v4125_v47 }
 0x13c   : > { %1191 = vmatmul.mubr.f32.gmra.mrb[22].mxu1 %v863_v58 }
 0x1e2   : > { %v931_v15 = vpop.f32.mrb[0].mxu0 }
 0x1e3   : > { %1196 = vst [vmem:[%s3786_s25] sm:$0xff] %v931_v15  ;;  %v1044_v22 = vpop.f32.mrb[0].mxu1  ;;  %v933_v19 = vpop.f32.mrb[1].mxu0 }
 0x1e4   : > { %1198 = vst [vmem:[%s3786_s25 + $0x10] sm:$0xff] %v1044_v22  ;;  %1197 = vst [vmem:[%s3786_s25 + $0x8] sm:$0xff] %v933_v19  ;;  %v1046_v59 = vpop.f32.mrb[1].mxu1 }
 0x1e5   : > { %1199 = vst [vmem:[%s3786_s25 + $0x18] sm:$0xff] %v1046_v59 }
 0x1e6   : > { %v937_v60 = vpop.f32.mrb[2].mxu0 }
 0x1e7   : > { %1202 = vst [vmem:[%s3786_s25 + $0x28] sm:$0xff] %v937_v60  ;;  %v1050_v61 = vpop.f32.mrb[2].mxu1  ;;  %v939_v62 = vpop.f32.mrb[3].mxu0 }
 0x1e8   : > { %1204 = vst [vmem:[%s3786_s25 + $0x38] sm:$0xff] %v1050_v61  ;;  %1203 = vst [vmem:[%s3786_s25 + $0x30] sm:$0xff] %v939_v62  ;;  %v1052_v63 = vpop.f32.mrb[3].mxu1 }
 0x1e9   : > { %1205 = vst [vmem:[%s3786_s25 + $0x40] sm:$0xff] %v1052_v63 }
 0x1ea   : > { %v943_v0 = vpop.f32.mrb[4].mxu0 }
 0x1eb   : > { %1207 = vst [vmem:[%s3786_s25 + $0x50] sm:$0xff] %v943_v0  ;;  %v1056_v2 = vpop.f32.mrb[4].mxu1  ;;  %v945_v3 = vpop.f32.mrb[5].mxu0 }
 0x1ec   : > { %1209 = vst [vmem:[%s3786_s25 + $0x60] sm:$0xff] %v1056_v2  ;;  %1208 = vst [vmem:[%s3786_s25 + $0x58] sm:$0xff] %v945_v3  ;;  %v1058_v5 = vpop.f32.mrb[5].mxu1 }
 0x1ed   : > { %1210 = vst [vmem:[%s3786_s25 + $0x68] sm:$0xff] %v1058_v5 }
 0x1ee   : > { %v949_v6 = vpop.f32.mrb[6].mxu0 }
 0x1ef   : > { %1212 = vst [vmem:[%s3786_s25 + $0x78] sm:$0xff] %v949_v6  ;;  %v1062_v7 = vpop.f32.mrb[6].mxu1  ;;  %v951_v10 = vpop.f32.mrb[7].mxu0 }
 0x1f0   : > { %1214 = vst [vmem:[%s3786_s25 + $0x88] sm:$0xff] %v1062_v7  ;;  %1213 = vst [vmem:[%s3786_s25 + $0x80] sm:$0xff] %v951_v10  ;;  %v1064_v11 = vpop.f32.mrb[7].mxu1 }
 0x1f1   : > { %1215 = vst [vmem:[%s3786_s25 + $0x90] sm:$0xff] %v1064_v11 }
 0x1f2   : > { %v955_v12 = vpop.f32.mrb[8].mxu0 }
 0x1f3   : > { %1217 = vst [vmem:[%s3786_s25 + $0xa0] sm:$0xff] %v955_v12  ;;  %v1068_v14 = vpop.f32.mrb[8].mxu1  ;;  %v957_v16 = vpop.f32.mrb[9].mxu0 }
 0x1f4   : > { %1219 = vst [vmem:[%s3786_s25 + $0xb0] sm:$0xff] %v1068_v14  ;;  %1218 = vst [vmem:[%s3786_s25 + $0xa8] sm:$0xff] %v957_v16  ;;  %v1070_v17 = vpop.f32.mrb[9].mxu1 }
 0x1f5   : > { %1220 = vst [vmem:[%s3786_s25 + $0xb8] sm:$0xff] %v1070_v17 }
 0x1f6   : > { %v961_v18 = vpop.f32.mrb[10].mxu0 }
 0x1f7   : > { %1222 = vst [vmem:[%s3786_s25 + $0xc8] sm:$0xff] %v961_v18  ;;  %v1074_v20 = vpop.f32.mrb[10].mxu1  ;;  %v963_v21 = vpop.f32.mrb[11].mxu0 }
 0x1f8   : > { %1224 = vst [vmem:[%s3786_s25 + $0xd8] sm:$0xff] %v1074_v20  ;;  %1223 = vst [vmem:[%s3786_s25 + $0xd0] sm:$0xff] %v963_v21  ;;  %v1076_v23 = vpop.f32.mrb[11].mxu1 }
 0x1f9   : > { %1225 = vst [vmem:[%s3786_s25 + $0xe0] sm:$0xff] %v1076_v23 }
 0x1fa   : > { %v967_v24 = vpop.f32.mrb[12].mxu0 }
 0x1fb   : > { %1227 = vst [vmem:[%s3786_s25 + $0xf0] sm:$0xff] %v967_v24  ;;  %v1080_v25 = vpop.f32.mrb[12].mxu1  ;;  %v969_v26 = vpop.f32.mrb[13].mxu0 }
 0x1fc   : > { %1229 = vst [vmem:[%s3786_s25 + $0x100] sm:$0xff] %v1080_v25  ;;  %1228 = vst [vmem:[%s3786_s25 + $0xf8] sm:$0xff] %v969_v26  ;;  %v1082_v27 = vpop.f32.mrb[13].mxu1 }
 0x1fd   : > { %1230 = vst [vmem:[%s3786_s25 + $0x108] sm:$0xff] %v1082_v27 }
 0x1fe   : > { %v973_v28 = vpop.f32.mrb[14].mxu0 }
 0x1ff   : > { %1232 = vst [vmem:[%s3786_s25 + $0x118] sm:$0xff] %v973_v28  ;;  %v1086_v29 = vpop.f32.mrb[14].mxu1  ;;  %v975_v30 = vpop.f32.mrb[15].mxu0 }
 0x200   : > { %1234 = vst [vmem:[%s3786_s25 + $0x128] sm:$0xff] %v1086_v29  ;;  %1233 = vst [vmem:[%s3786_s25 + $0x120] sm:$0xff] %v975_v30  ;;  %v1088_v31 = vpop.f32.mrb[15].mxu1 }
 0x201   : > { %1235 = vst [vmem:[%s3786_s25 + $0x130] sm:$0xff] %v1088_v31 }
 0x202   : > { %v1157_v32 = vpop.f32.mrb[16].mxu0 }
 0x203   : > { %1201 = vst.msk [vmem:[%s3786_s25 + $0x20] sm:$0xff] %vm1200_vm9, %v1157_v32  ;;  %v1177_v33 = vpop.f32.mrb[16].mxu1  ;;  %v1159_v34 = vpop.f32.mrb[17].mxu0 }
 0x204   : > { %1221 = vst.msk [vmem:[%s3786_s25 + $0xc0] sm:$0xff] %vm1200_vm9, %v1177_v33  ;;  %v1179_v35 = vpop.f32.mrb[17].mxu1 }
 0x206   : > { %v1162_v36 = vpop.f32.mrb[18].mxu0 }
 0x207   : > { %1206 = vst.msk [vmem:[%s3786_s25 + $0x48] sm:$0xff] %vm1200_vm9, %v1162_v36  ;;  %v1182_v37 = vpop.f32.mrb[18].mxu1  ;;  %v1164_v38 = vpop.f32.mrb[19].mxu0 }
 0x208   : > { %1226 = vst.msk [vmem:[%s3786_s25 + $0xe8] sm:$0xff] %vm1200_vm9, %v1182_v37  ;;  %v1184_v39 = vpop.f32.mrb[19].mxu1 }
 0x20a   : > { %v1167_v40 = vpop.f32.mrb[20].mxu0  ;;  %2372 = sbr.rel (%p2717_p2) target bundleno = 928 (0x3a0), region = 86 }
 0x20b   : > { %1211 = vst.msk [vmem:[%s3786_s25 + $0x70] sm:$0xff] %vm1200_vm9, %v1167_v40  ;;  %v1187_v41 = vpop.f32.mrb[20].mxu1  ;;  %v1169_v42 = vpop.f32.mrb[21].mxu0 }
 0x20c   : > { %1231 = vst.msk [vmem:[%s3786_s25 + $0x110] sm:$0xff] %vm1200_vm9, %v1187_v41  ;;  %v1189_v43 = vpop.f32.mrb[21].mxu1 }
 0x20e   : > { %v1172_v44 = vpop.f32.mrb[22].mxu0 }
 0x20f   : > { %1216 = vst.msk [vmem:[%s3786_s25 + $0x98] sm:$0xff] %vm1200_vm9, %v1172_v44  ;;  %v1192_v45 = vpop.f32.mrb[22].mxu1  ;;  %v1174_v46 = vpop.f32.mrb[23].mxu0 }
 0x210   : > { %1236 = vst.msk [vmem:[%s3786_s25 + $0x138] sm:$0xff] %vm1200_vm9, %v1192_v45  ;;  %v1194_v47 = vpop.f32.mrb[23].mxu1 }
 0x211 LB: >> { %s4222_s12 = sadd.s32 %s3587_s7, %s3779_s26  ;;  %v1289_v50 = vld [vmem:[#allocation5 + $0x8] sm:$0xff]  ;;  %v1291_v51 = vld [vmem:[#allocation5 + $0x18] sm:$0xff]  ;;  %v1288_v54 = vld [vmem:[#allocation5] sm:$0xff]  ;;  %v3597_v60 = vmov 1.0|1.0   ;;  %s1240_s7 = sadd.s32 1, %s3587_s7   ;;  %s3587_s7 = sphi %s4215_s7, %s1240_s7  }
 0x212   : >> { %s2718_s23 = sshll.u32 %s4222_s12, 1  ;;  %v1353_v52 = vld [vmem:[#allocation5 + $0x208] sm:$0xff]  ;;  %v1355_v53 = vld [vmem:[#allocation5 + $0x218] sm:$0xff]  ;;  %v1290_v56 = vld [vmem:[#allocation5 + $0x10] sm:$0xff]  ;;  %s3013_s17 = sshll.u32 %s4222_s12, 7 }
 0x213   : >> { %s1285_s20 = scalar_lea.vmem %s4695_s3, %s2718_s23  ;;  %v1352_v57 = vld [vmem:[#allocation5 + $0x200] sm:$0xff]  ;;  %v1354_v58 = vld [vmem:[#allocation5 + $0x210] sm:$0xff]  ;;  %v1293_v15 = vld [vmem:[#allocation5 + $0x28] sm:$0xff]  ;;  %s4332_s21 = scalar_lea.vmem [#allocation8], %s3013_s17 }
 0x214   : >> { %v1286_v48 = vld [vmem:[%s1285_s20] sm:$0x3]  ;;  %v1357_v19 = vld [vmem:[#allocation5 + $0x228] sm:$0xff]  ;;  %v1292_v61 = vld [vmem:[#allocation5 + $0x20] sm:$0xff]  ;;  %p1239_p4 = scmp.ge.s32.totalorder %s1240_s7, %s3782_s15 }
 0x215   : >> { %v1287_v49 = vsub.s32 %v1286_v48, %v3841_v1  ;;  %v1295_v22 = vld [vmem:[#allocation5 + $0x38] sm:$0xff]  ;;  %v1294_v62 = vld [vmem:[#allocation5 + $0x30] sm:$0xff]  ;;  %v1356_v63 = vld [vmem:[#allocation5 + $0x220] sm:$0xff] }
 0x216   : >> { %v1359_v59 = vld [vmem:[#allocation5 + $0x238] sm:$0xff]  ;;  %v1358_v0 = vld [vmem:[#allocation5 + $0x230] sm:$0xff]  ;;  %v1297_v2 = vld [vmem:[#allocation5 + $0x48] sm:$0xff] }
 0x217   : >> { %v4231_v55 = vrot.slane %v1287_v49, %v412_v8  ;;  %v4235_v13 = vrot.slane %v1287_v49, %v408_v9  ;;  %v1299_v3 = vld [vmem:[#allocation5 + $0x58] sm:$0xff]  ;;  %v1361_v5 = vld [vmem:[#allocation5 + $0x248] sm:$0xff]  ;;  %v1296_v7 = vld [vmem:[#allocation5 + $0x40] sm:$0xff] }
 0x218   : >> { %v1363_v6 = vld [vmem:[#allocation5 + $0x258] sm:$0xff]  ;;  %v1298_v10 = vld [vmem:[#allocation5 + $0x50] sm:$0xff]  ;;  %v1360_v11 = vld [vmem:[#allocation5 + $0x240] sm:$0xff] }
 0x219   : >> { %vm1441_vm10 = vcmp.eq.s32.totalorder %v4231_v55, %v1289_v50  ;;  %vm1443_vm11 = vcmp.eq.s32.totalorder %v4231_v55, %v1291_v51  ;;  %vm1505_vm12 = vcmp.eq.s32.totalorder %v4231_v55, %v1353_v52  ;;  %vm1507_vm13 = vcmp.eq.s32.totalorder %v4231_v55, %v1355_v53  ;;  %v1362_v12 = vld [vmem:[#allocation5 + $0x250] sm:$0xff]  ;;  %v1301_v14 = vld [vmem:[#allocation5 + $0x68] sm:$0xff]  ;;  %v1303_v16 = vld [vmem:[#allocation5 + $0x78] sm:$0xff] }
 0x21a   : >> { %vm3158_vm14 = vmpackc.low %vm1443_vm11, %vm1441_vm10  ;;  %vm1440_vm15 = vcmp.eq.s32.totalorder %v4235_v13, %v1288_v54  ;;  %vm1442_vm0 = vcmp.eq.s32.totalorder %v4235_v13, %v1290_v56  ;;  %vm1504_vm1 = vcmp.eq.s32.totalorder %v4235_v13, %v1352_v57  ;;  %vm1506_vm2 = vcmp.eq.s32.totalorder %v4235_v13, %v1354_v58  ;;  %v1365_v17 = vld [vmem:[#allocation5 + $0x268] sm:$0xff]  ;;  %v1367_v18 = vld [vmem:[#allocation5 + $0x278] sm:$0xff] }
 0x21b   : >> { %3159 = vmatprep.subr.msk.bf16.mxu0 %vm3158_vm14, %v3597_v60  ;;  %vm3222_vm3 = vmpackc.low %vm1507_vm13, %vm1505_vm12  ;;  %vm1445_vm4 = vcmp.eq.s32.totalorder %v4231_v55, %v1293_v15  ;;  %vm1447_vm5 = vcmp.eq.s32.totalorder %v4231_v55, %v1295_v22  ;;  %vm1509_vm7 = vcmp.eq.s32.totalorder %v4231_v55, %v1357_v19  ;;  %vm1511_vm8 = vcmp.eq.s32.totalorder %v4231_v55, %v1359_v59  ;;  %v1300_v20 = vld [vmem:[#allocation5 + $0x60] sm:$0xff]  ;;  %v1302_v21 = vld [vmem:[#allocation5 + $0x70] sm:$0xff] }
 0x21c   : >> { %3223 = vmatprep.subr.msk.bf16.mxu1 %vm3222_vm3, %v3597_v60  ;;  %vm3160_vm6 = vmpackc.low %vm1442_vm0, %vm1440_vm15  ;;  %vm1444_vm12 = vcmp.eq.s32.totalorder %v4235_v13, %v1292_v61  ;;  %vm1446_vm13 = vcmp.eq.s32.totalorder %v4235_v13, %v1294_v62  ;;  %vm1508_vm15 = vcmp.eq.s32.totalorder %v4235_v13, %v1356_v63  ;;  %vm1510_vm0 = vcmp.eq.s32.totalorder %v4235_v13, %v1358_v0  ;;  %v1364_v23 = vld [vmem:[#allocation5 + $0x260] sm:$0xff]  ;;  %v1366_v24 = vld [vmem:[#allocation5 + $0x270] sm:$0xff] }
 0x21d   : >> { %3161 = vmatpush1.bf16.xpose.msk.msra.mxu0 %vm3160_vm6, %v3597_v60  ;;  %vm3224_vm10 = vmpackc.low %vm1506_vm2, %vm1504_vm1  ;;  %vm1449_vm1 = vcmp.eq.s32.totalorder %v4231_v55, %v1297_v2  ;;  %vm1451_vm2 = vcmp.eq.s32.totalorder %v4231_v55, %v1299_v3  ;;  %v1305_v25 = vld [vmem:[#allocation5 + $0x88] sm:$0xff]  ;;  %v1307_v26 = vld [vmem:[#allocation5 + $0x98] sm:$0xff] }
 0x21e   : >> { %3225 = vmatpush1.bf16.xpose.msk.msra.mxu1 %vm3224_vm10, %v3597_v60  ;;  %vm3162_vm11 = vmpackc.low %vm1447_vm5, %vm1445_vm4  ;;  %vm1513_vm4 = vcmp.eq.s32.totalorder %v4231_v55, %v1361_v5  ;;  %vm1515_vm5 = vcmp.eq.s32.totalorder %v4231_v55, %v1363_v6  ;;  %v1369_v27 = vld [vmem:[#allocation5 + $0x288] sm:$0xff]  ;;  %v1371_v28 = vld [vmem:[#allocation5 + $0x298] sm:$0xff] }
 0x21f   : >> { %3163 = vmatprep.subr.msk.bf16.mxu0 %vm3162_vm11, %v3597_v60  ;;  %vm3226_vm14 = vmpackc.low %vm1511_vm8, %vm1509_vm7  ;;  %vm1448_vm8 = vcmp.eq.s32.totalorder %v4235_v13, %v1296_v7  ;;  %vm1450_vm11 = vcmp.eq.s32.totalorder %v4235_v13, %v1298_v10  ;;  %v1304_v29 = vld [vmem:[#allocation5 + $0x80] sm:$0xff]  ;;  %v1306_v30 = vld [vmem:[#allocation5 + $0x90] sm:$0xff] }
 0x220   : >> { %3227 = vmatprep.subr.msk.bf16.mxu1 %vm3226_vm14, %v3597_v60  ;;  %vm3164_vm3 = vmpackc.low %vm1446_vm13, %vm1444_vm12  ;;  %vm1512_vm12 = vcmp.eq.s32.totalorder %v4235_v13, %v1360_v11  ;;  %vm1514_vm13 = vcmp.eq.s32.totalorder %v4235_v13, %v1362_v12  ;;  %vm1453_vm14 = vcmp.eq.s32.totalorder %v4231_v55, %v1301_v14  ;;  %v1368_v31 = vld [vmem:[#allocation5 + $0x280] sm:$0xff]  ;;  %v1370_v32 = vld [vmem:[#allocation5 + $0x290] sm:$0xff] }
 0x221   : >> { %vm3228_vm6 = vmpackc.low %vm1510_vm0, %vm1508_vm15  ;;  %vm1455_vm15 = vcmp.eq.s32.totalorder %v4231_v55, %v1303_v16  ;;  %v1309_v33 = vld [vmem:[#allocation5 + $0xa8] sm:$0xff]  ;;  %v1311_v34 = vld [vmem:[#allocation5 + $0xb8] sm:$0xff] }
 0x222   : >> { %vm3166_vm10 = vmpackc.low %vm1451_vm2, %vm1449_vm1  ;;  %vm1517_vm1 = vcmp.eq.s32.totalorder %v4231_v55, %v1365_v17  ;;  %vm1519_vm2 = vcmp.eq.s32.totalorder %v4231_v55, %v1367_v18  ;;  %v1373_v35 = vld [vmem:[#allocation5 + $0x2a8] sm:$0xff]  ;;  %v1375_v36 = vld [vmem:[#allocation5 + $0x2b8] sm:$0xff] }
 0x223   : >> { %vm3230_vm7 = vmpackc.low %vm1515_vm5, %vm1513_vm4  ;;  %v1308_v37 = vld [vmem:[#allocation5 + $0xa0] sm:$0xff]  ;;  %v1310_v38 = vld [vmem:[#allocation5 + $0xb0] sm:$0xff] }
 0x224   : >> { %vm3168_vm0 = vmpackc.low %vm1450_vm11, %vm1448_vm8  ;;  %vm1518_vm8 = vcmp.eq.s32.totalorder %v4235_v13, %v1366_v24  ;;  %vm1457_vm11 = vcmp.eq.s32.totalorder %v4231_v55, %v1305_v25  ;;  %v1372_v39 = vld [vmem:[#allocation5 + $0x2a0] sm:$0xff]  ;;  %v1374_v40 = vld [vmem:[#allocation5 + $0x2b0] sm:$0xff] }
 0x225   : >> { %3165 = vmatpush1.bf16.xpose.msk.msra.mxu0 %vm3164_vm3, %v3597_v60  ;;  %vm3232_vm3 = vmpackc.low %vm1514_vm13, %vm1512_vm12  ;;  %vm1459_vm12 = vcmp.eq.s32.totalorder %v4231_v55, %v1307_v26  ;;  %v1313_v41 = vld [vmem:[#allocation5 + $0xc8] sm:$0xff]  ;;  %v1315_v42 = vld [vmem:[#allocation5 + $0xd8] sm:$0xff] }
 0x226   : >> { %3229 = vmatpush1.bf16.xpose.msk.msra.mxu1 %vm3228_vm6, %v3597_v60  ;;  %3167 = vmatprep.subr.msk.bf16.mxu0 %vm3166_vm10, %v3597_v60  ;;  %vm3170_vm4 = vmpackc.low %vm1455_vm15, %vm1453_vm14  ;;  %vm1452_vm6 = vcmp.eq.s32.totalorder %v4235_v13, %v1300_v20  ;;  %vm1454_vm10 = vcmp.eq.s32.totalorder %v4235_v13, %v1302_v21  ;;  %vm1521_vm14 = vcmp.eq.s32.totalorder %v4231_v55, %v1369_v27  ;;  %v1377_v43 = vld [vmem:[#allocation5 + $0x2c8] sm:$0xff]  ;;  %v1379_v44 = vld [vmem:[#allocation5 + $0x2d8] sm:$0xff] }
 0x227   : >> { %3231 = vmatprep.subr.msk.bf16.mxu1 %vm3230_vm7, %v3597_v60  ;;  %vm3234_vm5 = vmpackc.low %vm1519_vm2, %vm1517_vm1  ;;  %vm1516_vm7 = vcmp.eq.s32.totalorder %v4235_v13, %v1364_v23  ;;  %vm1523_vm15 = vcmp.eq.s32.totalorder %v4231_v55, %v1371_v28  ;;  %v1312_v45 = vld [vmem:[#allocation5 + $0xc0] sm:$0xff]  ;;  %v1314_v46 = vld [vmem:[#allocation5 + $0xd0] sm:$0xff] }
 0x228   : >> { %vm3172_vm13 = vmpackc.low %vm1454_vm10, %vm1452_vm6  ;;  %vm1522_vm6 = vcmp.eq.s32.totalorder %v4235_v13, %v1370_v32  ;;  %vm1461_vm10 = vcmp.eq.s32.totalorder %v4231_v55, %v1309_v33  ;;  %v1376_v47 = vld [vmem:[#allocation5 + $0x2c0] sm:$0xff]  ;;  %v1378_v48 = vld [vmem:[#allocation5 + $0x2d0] sm:$0xff] }
 0x229   : >> { %vm3174_vm1 = vmpackc.low %vm1459_vm12, %vm1457_vm11  ;;  %vm1525_vm11 = vcmp.eq.s32.totalorder %v4231_v55, %v1373_v35  ;;  %vm1527_vm12 = vcmp.eq.s32.totalorder %v4231_v55, %v1375_v36  ;;  %v1317_v49 = vld [vmem:[#allocation5 + $0xe8] sm:$0xff]  ;;  %v1319_v50 = vld [vmem:[#allocation5 + $0xf8] sm:$0xff] }
 0x22a   : >> { %vm3238_vm2 = vmpackc.low %vm1523_vm15, %vm1521_vm14  ;;  %v1381_v51 = vld [vmem:[#allocation5 + $0x2e8] sm:$0xff]  ;;  %v1383_v52 = vld [vmem:[#allocation5 + $0x2f8] sm:$0xff] }
 0x22b   : >> { %vm3242_vm15 = vmpackc.low %vm1527_vm12, %vm1525_vm11  ;;  %v4335_v53 = vld [vmem:[%s4332_s21 + $0x8] sm:$0xff]  ;;  %v1318_v56 = vld [vmem:[#allocation5 + $0xf0] sm:$0xff] }
 0x22c   : >> { %v1316_v54 = vld [vmem:[#allocation5 + $0xe0] sm:$0xff]  ;;  %1955 = vmatprep.mubr.f32.mxu0 %v4335_v53  ;;  %2068 = vmatprep.mubr.f32.mxu1 %v4335_v53  ;;  %v1382_v58 = vld [vmem:[#allocation5 + $0x2f0] sm:$0xff]  ;;  %v1321_v15 = vld [vmem:[#allocation5 + $0x108] sm:$0xff] }
 0x22d   : >> { %3169 = vmatpush1.bf16.xpose.msk.msra.mxu0 %vm3168_vm0, %v3597_v60  ;;  %vm3236_vm0 = vmpackc.low %vm1518_vm8, %vm1516_vm7  ;;  %vm1463_vm7 = vcmp.eq.s32.totalorder %v4231_v55, %v1311_v34  ;;  %v1380_v57 = vld [vmem:[#allocation5 + $0x2e0] sm:$0xff]  ;;  %v1323_v22 = vld [vmem:[#allocation5 + $0x118] sm:$0xff] }
 0x22e   : >> { %3233 = vmatpush1.bf16.xpose.msk.msra.mxu1 %vm3232_vm3, %v3597_v60  ;;  %3171 = vmatprep.subr.msk.bf16.mxu0 %vm3170_vm4, %v3597_v60  ;;  %vm1456_vm3 = vcmp.eq.s32.totalorder %v4235_v13, %v1304_v29  ;;  %vm1458_vm4 = vcmp.eq.s32.totalorder %v4235_v13, %v1306_v30  ;;  %vm3178_vm14 = vmpackc.low %vm1463_vm7, %vm1461_vm10  ;;  %vm1529_vm10 = vcmp.eq.s32.totalorder %v4231_v55, %v1377_v43  ;;  %v1385_v19 = vld [vmem:[#allocation5 + $0x308] sm:$0xff]  ;;  %v1387_v59 = vld [vmem:[#allocation5 + $0x318] sm:$0xff] }
 0x22f   : >> { %3235 = vmatprep.subr.msk.bf16.mxu1 %vm3234_vm5, %v3597_v60  ;;  %vm1520_vm5 = vcmp.eq.s32.totalorder %v4235_v13, %v1368_v31  ;;  %vm3176_vm8 = vmpackc.low %vm1458_vm4, %vm1456_vm3  ;;  %vm1526_vm3 = vcmp.eq.s32.totalorder %v4235_v13, %v1374_v40  ;;  %vm1465_vm4 = vcmp.eq.s32.totalorder %v4231_v55, %v1313_v41  ;;  %vm1531_vm7 = vcmp.eq.s32.totalorder %v4231_v55, %v1379_v44  ;;  %v1320_v61 = vld [vmem:[#allocation5 + $0x100] sm:$0xff]  ;;  %v1322_v62 = vld [vmem:[#allocation5 + $0x110] sm:$0xff] }
 0x230   : >> { %vm3246_vm12 = vmpackc.low %vm1531_vm7, %vm1529_vm10  ;;  %v1384_v63 = vld [vmem:[#allocation5 + $0x300] sm:$0xff]  ;;  %v1386_v0 = vld [vmem:[#allocation5 + $0x310] sm:$0xff] }
 0x231   : >> { %v1325_v2 = vld [vmem:[#allocation5 + $0x128] sm:$0xff]  ;;  %v1327_v3 = vld [vmem:[#allocation5 + $0x138] sm:$0xff]  ;;  %v1324_v7 = vld [vmem:[#allocation5 + $0x120] sm:$0xff] }
 0x232   : >> { %v1389_v5 = vld [vmem:[#allocation5 + $0x328] sm:$0xff]  ;;  %v1391_v6 = vld [vmem:[#allocation5 + $0x338] sm:$0xff]  ;;  %v1326_v10 = vld [vmem:[#allocation5 + $0x130] sm:$0xff] }
 0x233   : >> { %v1388_v11 = vld [vmem:[#allocation5 + $0x320] sm:$0xff]  ;;  %v1390_v12 = vld [vmem:[#allocation5 + $0x330] sm:$0xff]  ;;  %v1329_v14 = vld [vmem:[#allocation5 + $0x148] sm:$0xff] }
 0x234   : >> { %v1331_v16 = vld [vmem:[#allocation5 + $0x158] sm:$0xff]  ;;  %v1393_v17 = vld [vmem:[#allocation5 + $0x348] sm:$0xff]  ;;  %v1328_v20 = vld [vmem:[#allocation5 + $0x140] sm:$0xff] }
 0x235   : >> { %3173 = vmatpush1.bf16.xpose.msk.msra.mxu0 %vm3172_vm13, %v3597_v60  ;;  %vm3240_vm13 = vmpackc.low %vm1522_vm6, %vm1520_vm5  ;;  %vm1467_vm5 = vcmp.eq.s32.totalorder %v4231_v55, %v1315_v42  ;;  %v1395_v18 = vld [vmem:[#allocation5 + $0x358] sm:$0xff]  ;;  %v1330_v21 = vld [vmem:[#allocation5 + $0x150] sm:$0xff] }
 0x236   : >> { %3237 = vmatpush1.bf16.xpose.msk.msra.mxu1 %vm3236_vm0, %v3597_v60  ;;  %3175 = vmatprep.subr.msk.bf16.mxu0 %vm3174_vm1, %v3597_v60  ;;  %vm1460_vm0 = vcmp.eq.s32.totalorder %v4235_v13, %v1308_v37  ;;  %vm1462_vm1 = vcmp.eq.s32.totalorder %v4235_v13, %v1310_v38  ;;  %vm3182_vm11 = vmpackc.low %vm1467_vm5, %vm1465_vm4  ;;  %vm1533_vm4 = vcmp.eq.s32.totalorder %v4231_v55, %v1381_v51  ;;  %v1392_v23 = vld [vmem:[#allocation5 + $0x340] sm:$0xff]  ;;  %v1394_v24 = vld [vmem:[#allocation5 + $0x350] sm:$0xff] }
 0x237   : >> { %3239 = vmatprep.subr.msk.bf16.mxu1 %vm3238_vm2, %v3597_v60  ;;  %vm1524_vm2 = vcmp.eq.s32.totalorder %v4235_v13, %v1372_v39  ;;  %vm3180_vm6 = vmpackc.low %vm1462_vm1, %vm1460_vm0  ;;  %vm1530_vm0 = vcmp.eq.s32.totalorder %v4235_v13, %v1378_v48  ;;  %vm1469_vm1 = vcmp.eq.s32.totalorder %v4231_v55, %v1317_v49  ;;  %vm1535_vm5 = vcmp.eq.s32.totalorder %v4231_v55, %v1383_v52  ;;  %v1333_v25 = vld [vmem:[#allocation5 + $0x168] sm:$0xff]  ;;  %v1335_v26 = vld [vmem:[#allocation5 + $0x178] sm:$0xff] }
 0x238   : >> { %vm3250_vm7 = vmpackc.low %vm1535_vm5, %vm1533_vm4  ;;  %v1397_v27 = vld [vmem:[#allocation5 + $0x368] sm:$0xff]  ;;  %v1399_v28 = vld [vmem:[#allocation5 + $0x378] sm:$0xff] }
 0x239   : >> { %v1332_v29 = vld [vmem:[#allocation5 + $0x160] sm:$0xff]  ;;  %v1334_v30 = vld [vmem:[#allocation5 + $0x170] sm:$0xff]  ;;  %v1337_v33 = vld [vmem:[#allocation5 + $0x188] sm:$0xff] }
 0x23a   : >> { %v1396_v31 = vld [vmem:[#allocation5 + $0x360] sm:$0xff]  ;;  %v1398_v32 = vld [vmem:[#allocation5 + $0x370] sm:$0xff]  ;;  %v1339_v34 = vld [vmem:[#allocation5 + $0x198] sm:$0xff] }
 0x23b   : >> { %v1401_v35 = vld [vmem:[#allocation5 + $0x388] sm:$0xff]  ;;  %v1403_v36 = vld [vmem:[#allocation5 + $0x398] sm:$0xff]  ;;  %v1336_v37 = vld [vmem:[#allocation5 + $0x180] sm:$0xff] }
 0x23c   : >> { %v1338_v38 = vld [vmem:[#allocation5 + $0x190] sm:$0xff]  ;;  %v1400_v39 = vld [vmem:[#allocation5 + $0x380] sm:$0xff]  ;;  %v1341_v41 = vld [vmem:[#allocation5 + $0x1a8] sm:$0xff] }
 0x23d   : >> { %3177 = vmatpush1.bf16.xpose.msk.msra.mxu0 %vm3176_vm8, %v3597_v60  ;;  %vm3244_vm8 = vmpackc.low %vm1526_vm3, %vm1524_vm2  ;;  %vm1471_vm2 = vcmp.eq.s32.totalorder %v4231_v55, %v1319_v50  ;;  %v1402_v40 = vld [vmem:[#allocation5 + $0x390] sm:$0xff]  ;;  %v1343_v42 = vld [vmem:[#allocation5 + $0x1b8] sm:$0xff] }
 0x23e   : >> { %3241 = vmatpush1.bf16.xpose.msk.msra.mxu1 %vm3240_vm13, %v3597_v60  ;;  %3179 = vmatprep.subr.msk.bf16.mxu0 %vm3178_vm14, %v3597_v60  ;;  %vm1464_vm13 = vcmp.eq.s32.totalorder %v4235_v13, %v1312_v45  ;;  %vm1466_vm14 = vcmp.eq.s32.totalorder %v4235_v13, %v1314_v46  ;;  %vm3186_vm10 = vmpackc.low %vm1471_vm2, %vm1469_vm1  ;;  %vm1537_vm1 = vcmp.eq.s32.totalorder %v4231_v55, %v1385_v19  ;;  %v1405_v43 = vld [vmem:[#allocation5 + $0x3a8] sm:$0xff]  ;;  %v1407_v44 = vld [vmem:[#allocation5 + $0x3b8] sm:$0xff] }
 0x23f   : >> { %3243 = vmatprep.subr.msk.bf16.mxu1 %vm3242_vm15, %v3597_v60  ;;  %vm1528_vm15 = vcmp.eq.s32.totalorder %v4235_v13, %v1376_v47  ;;  %vm3184_vm3 = vmpackc.low %vm1466_vm14, %vm1464_vm13  ;;  %vm1534_vm13 = vcmp.eq.s32.totalorder %v4235_v13, %v1382_v58  ;;  %vm1473_vm14 = vcmp.eq.s32.totalorder %v4231_v55, %v1321_v15  ;;  %vm1539_vm2 = vcmp.eq.s32.totalorder %v4231_v55, %v1387_v59  ;;  %v1340_v45 = vld [vmem:[#allocation5 + $0x1a0] sm:$0xff]  ;;  %v1342_v46 = vld [vmem:[#allocation5 + $0x1b0] sm:$0xff] }
 0x240   : >> { %vm3254_vm5 = vmpackc.low %vm1539_vm2, %vm1537_vm1  ;;  %v1404_v47 = vld [vmem:[#allocation5 + $0x3a0] sm:$0xff]  ;;  %v1406_v48 = vld [vmem:[#allocation5 + $0x3b0] sm:$0xff] }
 0x241   : >> { %v1345_v49 = vld [vmem:[#allocation5 + $0x1c8] sm:$0xff]  ;;  %v1347_v50 = vld [vmem:[#allocation5 + $0x1d8] sm:$0xff]  ;;  %v1410_v58 = vld [vmem:[#allocation5 + $0x3d0] sm:$0xff] }
 0x242   : >> { %v1409_v51 = vld [vmem:[#allocation5 + $0x3c8] sm:$0xff]  ;;  %v1411_v52 = vld [vmem:[#allocation5 + $0x3d8] sm:$0xff] }
 0x243   : >> { %v1349_v15 = vld [vmem:[#allocation5 + $0x1e8] sm:$0xff]  ;;  %v1415_v59 = vld [vmem:[#allocation5 + $0x3f8] sm:$0xff] }
 0x244   : >> { %v1413_v19 = vld [vmem:[#allocation5 + $0x3e8] sm:$0xff] }
 0x245   : >> { %3181 = vmatpush1.bf16.xpose.msk.msra.mxu0 %vm3180_vm6, %v3597_v60  ;;  %vm3248_vm6 = vmpackc.low %vm1530_vm0, %vm1528_vm15  ;;  %vm1475_vm15 = vcmp.eq.s32.totalorder %v4231_v55, %v1323_v22  ;;  %v1351_v22 = vld [vmem:[#allocation5 + $0x1f8] sm:$0xff] }
 0x246   : >> { %3245 = vmatpush1.bf16.xpose.msk.msra.mxu1 %vm3244_vm8, %v3597_v60  ;;  %3183 = vmatprep.subr.msk.bf16.mxu0 %vm3182_vm11, %v3597_v60  ;;  %vm1468_vm8 = vcmp.eq.s32.totalorder %v4235_v13, %v1316_v54  ;;  %vm1470_vm11 = vcmp.eq.s32.totalorder %v4235_v13, %v1318_v56  ;;  %vm3190_vm4 = vmpackc.low %vm1475_vm15, %vm1473_vm14  ;;  %vm1541_vm14 = vcmp.eq.s32.totalorder %v4231_v55, %v1389_v5  ;;  %v1344_v54 = vld [vmem:[#allocation5 + $0x1c0] sm:$0xff]  ;;  %v1346_v56 = vld [vmem:[#allocation5 + $0x1d0] sm:$0xff] }
 0x247   : >> { %3247 = vmatprep.subr.msk.bf16.mxu1 %vm3246_vm12, %v3597_v60  ;;  %vm1532_vm12 = vcmp.eq.s32.totalorder %v4235_v13, %v1380_v57  ;;  %vm3188_vm0 = vmpackc.low %vm1470_vm11, %vm1468_vm8  ;;  %vm1538_vm8 = vcmp.eq.s32.totalorder %v4235_v13, %v1386_v0  ;;  %vm1477_vm11 = vcmp.eq.s32.totalorder %v4231_v55, %v1325_v2  ;;  %vm1543_vm15 = vcmp.eq.s32.totalorder %v4231_v55, %v1391_v6  ;;  %v1408_v57 = vld [vmem:[#allocation5 + $0x3c0] sm:$0xff]  ;;  %v1414_v0 = vld [vmem:[#allocation5 + $0x3f0] sm:$0xff] }
 0x248   : >> { %vm3258_vm2 = vmpackc.low %vm1543_vm15, %vm1541_vm14  ;;  %v1417_v2 = vld [vmem:[#allocation5 + $0x408] sm:$0xff]  ;;  %v1416_v5 = vld [vmem:[#allocation5 + $0x400] sm:$0xff] }
 0x249   : >> { %v1418_v6 = vld [vmem:[#allocation5 + $0x410] sm:$0xff] }
 0x24d   : >> { %3185 = vmatpush1.bf16.xpose.msk.msra.mxu0 %vm3184_vm3, %v3597_v60  ;;  %vm3252_vm3 = vmpackc.low %vm1534_vm13, %vm1532_vm12  ;;  %vm1479_vm12 = vcmp.eq.s32.totalorder %v4231_v55, %v1327_v3  ;;  %v1419_v3 = vld [vmem:[#allocation5 + $0x418] sm:$0xff] }
 0x24e   : >> { %3249 = vmatpush1.bf16.xpose.msk.msra.mxu1 %vm3248_vm6, %v3597_v60  ;;  %3187 = vmatprep.subr.msk.bf16.mxu0 %vm3186_vm10, %v3597_v60  ;;  %vm1472_vm6 = vcmp.eq.s32.totalorder %v4235_v13, %v1320_v61  ;;  %vm1474_vm10 = vcmp.eq.s32.totalorder %v4235_v13, %v1322_v62  ;;  %vm3194_vm1 = vmpackc.low %vm1479_vm12, %vm1477_vm11  ;;  %vm1545_vm11 = vcmp.eq.s32.totalorder %v4231_v55, %v1393_v17  ;;  %v1348_v61 = vld [vmem:[#allocation5 + $0x1e0] sm:$0xff]  ;;  %v1350_v62 = vld [vmem:[#allocation5 + $0x1f0] sm:$0xff] }
 0x24f   : >> { %3251 = vmatprep.subr.msk.bf16.mxu1 %vm3250_vm7, %v3597_v60  ;;  %vm1536_vm7 = vcmp.eq.s32.totalorder %v4235_v13, %v1384_v63  ;;  %vm3192_vm13 = vmpackc.low %vm1474_vm10, %vm1472_vm6  ;;  %vm1542_vm6 = vcmp.eq.s32.totalorder %v4235_v13, %v1390_v12  ;;  %vm1481_vm10 = vcmp.eq.s32.totalorder %v4231_v55, %v1329_v14  ;;  %vm1547_vm12 = vcmp.eq.s32.totalorder %v4231_v55, %v1395_v18  ;;  %v1412_v63 = vld [vmem:[#allocation5 + $0x3e0] sm:$0xff]  ;;  %v4457_v12 = vld [vmem:[%s4332_s21 + $0x18] sm:$0xff] }
 0x250   : >> { %vm3262_vm15 = vmpackc.low %vm1547_vm12, %vm1545_vm11  ;;  %v1422_v17 = vld [vmem:[#allocation5 + $0x430] sm:$0xff]  ;;  %v4467_v18 = vld [vmem:[%s4332_s21 + $0x10] sm:$0xff] }
 0x251   : >> { %v1258_v14 = vld [vmem:[%s3786_s25 + $0x78] sm:$0xff] }
 0x255   : >> { %3189 = vmatpush1.bf16.xpose.msk.msra.mxu0 %vm3188_vm0, %v3597_v60  ;;  %vm3256_vm0 = vmpackc.low %vm1538_vm8, %vm1536_vm7  ;;  %vm1483_vm7 = vcmp.eq.s32.totalorder %v4231_v55, %v1331_v16  ;;  %v1420_v16 = vld [vmem:[#allocation5 + $0x420] sm:$0xff] }
 0x256   : >> { %3253 = vmatpush1.bf16.xpose.msk.msra.mxu1 %vm3252_vm3, %v3597_v60  ;;  %3191 = vmatprep.subr.msk.bf16.mxu0 %vm3190_vm4, %v3597_v60  ;;  %vm1476_vm3 = vcmp.eq.s32.totalorder %v4235_v13, %v1324_v7  ;;  %vm1478_vm4 = vcmp.eq.s32.totalorder %v4235_v13, %v1326_v10  ;;  %vm3198_vm14 = vmpackc.low %vm1483_vm7, %vm1481_vm10  ;;  %vm1549_vm10 = vcmp.eq.s32.totalorder %v4231_v55, %v1397_v27  ;;  %v1421_v7 = vld [vmem:[#allocation5 + $0x428] sm:$0xff]  ;;  %v1423_v10 = vld [vmem:[#allocation5 + $0x438] sm:$0xff] }
 0x257   : >> { %3255 = vmatprep.subr.msk.bf16.mxu1 %vm3254_vm5, %v3597_v60  ;;  %vm1540_vm5 = vcmp.eq.s32.totalorder %v4235_v13, %v1388_v11  ;;  %vm3196_vm8 = vmpackc.low %vm1478_vm4, %vm1476_vm3  ;;  %vm1546_vm3 = vcmp.eq.s32.totalorder %v4235_v13, %v1394_v24  ;;  %vm1485_vm4 = vcmp.eq.s32.totalorder %v4231_v55, %v1333_v25  ;;  %vm1551_vm7 = vcmp.eq.s32.totalorder %v4231_v55, %v1399_v28  ;;  %v4452_v11 = vld [vmem:[%s4332_s21] sm:$0xff]  ;;  %v4493_v25 = vld [vmem:[%s4332_s21 + $0x38] sm:$0xff] }
 0x258   : >> { %vm3266_vm12 = vmpackc.low %vm1551_vm7, %vm1549_vm10  ;;  %v4487_v24 = vld [vmem:[%s4332_s21 + $0x20] sm:$0xff]  ;;  %v1424_v27 = vld [vmem:[#allocation5 + $0x440] sm:$0xff] }
 0x259   : >> { %v1426_v28 = vld [vmem:[#allocation5 + $0x450] sm:$0xff] }
 0x25d   : >> { %3193 = vmatpush1.bf16.xpose.msk.msra.mxu0 %vm3192_vm13, %v3597_v60  ;;  %vm3260_vm13 = vmpackc.low %vm1542_vm6, %vm1540_vm5  ;;  %vm1487_vm5 = vcmp.eq.s32.totalorder %v4231_v55, %v1335_v26 }
 0x25e   : >> { %3257 = vmatpush1.bf16.xpose.msk.msra.mxu1 %vm3256_vm0, %v3597_v60  ;;  %3195 = vmatprep.subr.msk.bf16.mxu0 %vm3194_vm1, %v3597_v60  ;;  %vm1480_vm0 = vcmp.eq.s32.totalorder %v4235_v13, %v1328_v20  ;;  %vm1482_vm1 = vcmp.eq.s32.totalorder %v4235_v13, %v1330_v21  ;;  %vm3202_vm11 = vmpackc.low %vm1487_vm5, %vm1485_vm4  ;;  %vm1553_vm4 = vcmp.eq.s32.totalorder %v4231_v55, %v1401_v35  ;;  %v4472_v20 = vld [vmem:[%s4332_s21 + $0x28] sm:$0xff]  ;;  %v1425_v21 = vld [vmem:[#allocation5 + $0x448] sm:$0xff] }
 0x25f   : >> { %3259 = vmatprep.subr.msk.bf16.mxu1 %vm3258_vm2, %v3597_v60  ;;  %vm1544_vm2 = vcmp.eq.s32.totalorder %v4235_v13, %v1392_v23  ;;  %vm3200_vm6 = vmpackc.low %vm1482_vm1, %vm1480_vm0  ;;  %vm1550_vm0 = vcmp.eq.s32.totalorder %v4235_v13, %v1398_v32  ;;  %vm1489_vm1 = vcmp.eq.s32.totalorder %v4231_v55, %v1337_v33  ;;  %vm1555_vm5 = vcmp.eq.s32.totalorder %v4231_v55, %v1403_v36  ;;  %v1427_v23 = vld [vmem:[#allocation5 + $0x458] sm:$0xff]  ;;  %v1428_v35 = vld [vmem:[#allocation5 + $0x460] sm:$0xff] }
 0x260   : >> { %vm3270_vm7 = vmpackc.low %vm1555_vm5, %vm1553_vm4  ;;  %v1431_v32 = vld [vmem:[#allocation5 + $0x478] sm:$0xff]  ;;  %v1430_v36 = vld [vmem:[#allocation5 + $0x470] sm:$0xff] }
 0x261   : >> { %v1883_v33 = vld [vmem:[%s4332_s21 + $0x40] sm:$0xff] }
 0x265   : >> { %3197 = vmatpush1.bf16.xpose.msk.msra.mxu0 %vm3196_vm8, %v3597_v60  ;;  %vm3264_vm8 = vmpackc.low %vm1546_vm3, %vm1544_vm2  ;;  %vm1491_vm2 = vcmp.eq.s32.totalorder %v4231_v55, %v1339_v34  ;;  %v1886_v34 = vld [vmem:[%s4332_s21 + $0x58] sm:$0xff] }
 0x266   : >> { %3261 = vmatpush1.bf16.xpose.msk.msra.mxu1 %vm3260_vm13, %v3597_v60  ;;  %3199 = vmatprep.subr.msk.bf16.mxu0 %vm3198_vm14, %v3597_v60  ;;  %vm1484_vm13 = vcmp.eq.s32.totalorder %v4235_v13, %v1332_v29  ;;  %vm1486_vm14 = vcmp.eq.s32.totalorder %v4235_v13, %v1334_v30  ;;  %vm3206_vm10 = vmpackc.low %vm1491_vm2, %vm1489_vm1  ;;  %vm1557_vm1 = vcmp.eq.s32.totalorder %v4231_v55, %v1405_v43  ;;  %v4503_v29 = vld [vmem:[%s4332_s21 + $0x30] sm:$0xff]  ;;  %v1884_v30 = vld [vmem:[%s4332_s21 + $0x48] sm:$0xff] }
 0x267   : >> { %3263 = vmatprep.subr.msk.bf16.mxu1 %vm3262_vm15, %v3597_v60  ;;  %vm1548_vm15 = vcmp.eq.s32.totalorder %v4235_v13, %v1396_v31  ;;  %vm3204_vm3 = vmpackc.low %vm1486_vm14, %vm1484_vm13  ;;  %vm1554_vm13 = vcmp.eq.s32.totalorder %v4235_v13, %v1402_v40  ;;  %vm1493_vm14 = vcmp.eq.s32.totalorder %v4231_v55, %v1341_v41  ;;  %vm1559_vm2 = vcmp.eq.s32.totalorder %v4231_v55, %v1407_v44  ;;  %v1429_v31 = vld [vmem:[#allocation5 + $0x468] sm:$0xff] }
 0x268   : >> { %vm3274_vm5 = vmpackc.low %vm1559_vm2, %vm1557_vm1  ;;  %v1889_v40 = vld [vmem:[%s4332_s21 + $0x70] sm:$0xff] }
 0x26d   : >> { %3201 = vmatpush1.bf16.xpose.msk.msra.mxu0 %vm3200_vm6, %v3597_v60  ;;  %vm3268_vm6 = vmpackc.low %vm1550_vm0, %vm1548_vm15  ;;  %vm1495_vm15 = vcmp.eq.s32.totalorder %v4231_v55, %v1343_v42  ;;  %v1246_v42 = vld [vmem:[%s3786_s25 + $0x18] sm:$0xff] }
 0x26e   : >> { %3265 = vmatpush1.bf16.xpose.msk.msra.mxu1 %vm3264_vm8, %v3597_v60  ;;  %3203 = vmatprep.subr.msk.bf16.mxu0 %vm3202_vm11, %v3597_v60  ;;  %vm1488_vm8 = vcmp.eq.s32.totalorder %v4235_v13, %v1336_v37  ;;  %vm1490_vm11 = vcmp.eq.s32.totalorder %v4235_v13, %v1338_v38  ;;  %vm3210_vm4 = vmpackc.low %vm1495_vm15, %vm1493_vm14  ;;  %vm1561_vm14 = vcmp.eq.s32.totalorder %v4231_v55, %v1409_v51  ;;  %v1885_v37 = vld [vmem:[%s4332_s21 + $0x50] sm:$0xff]  ;;  %v1888_v38 = vld [vmem:[%s4332_s21 + $0x68] sm:$0xff] }
 0x26f   : >> { %3267 = vmatprep.subr.msk.bf16.mxu1 %vm3266_vm12, %v3597_v60  ;;  %vm1552_vm12 = vcmp.eq.s32.totalorder %v4235_v13, %v1400_v39  ;;  %vm3208_vm0 = vmpackc.low %vm1490_vm11, %vm1488_vm8  ;;  %vm1558_vm8 = vcmp.eq.s32.totalorder %v4235_v13, %v1406_v48  ;;  %vm1497_vm11 = vcmp.eq.s32.totalorder %v4231_v55, %v1345_v49  ;;  %vm1563_vm15 = vcmp.eq.s32.totalorder %v4231_v55, %v1411_v52  ;;  %v1890_v39 = vld [vmem:[%s4332_s21 + $0x78] sm:$0xff]  ;;  %v1248_v49 = vld [vmem:[%s3786_s25 + $0x28] sm:$0xff] }
 0x270   : >> { %vm3278_vm2 = vmpackc.low %vm1563_vm15, %vm1561_vm14  ;;  %v1250_v51 = vld [vmem:[%s3786_s25 + $0x38] sm:$0xff]  ;;  %v1249_v52 = vld [vmem:[%s3786_s25 + $0x30] sm:$0xff] }
 0x275   : >> { %3205 = vmatpush1.bf16.xpose.msk.msra.mxu0 %vm3204_vm3, %v3597_v60  ;;  %vm3272_vm3 = vmpackc.low %vm1554_vm13, %vm1552_vm12  ;;  %vm1499_vm12 = vcmp.eq.s32.totalorder %v4231_v55, %v1347_v50 }
 0x276   : >> { %3269 = vmatpush1.bf16.xpose.msk.msra.mxu1 %vm3268_vm6, %v3597_v60  ;;  %3207 = vmatprep.subr.msk.bf16.mxu0 %vm3206_vm10, %v3597_v60  ;;  %vm1492_vm6 = vcmp.eq.s32.totalorder %v4235_v13, %v1340_v45  ;;  %vm1494_vm10 = vcmp.eq.s32.totalorder %v4235_v13, %v1342_v46  ;;  %vm3214_vm1 = vmpackc.low %vm1499_vm12, %vm1497_vm11  ;;  %vm1565_vm11 = vcmp.eq.s32.totalorder %v4231_v55, %v1413_v19 }
 0x277   : >> { %3271 = vmatprep.subr.msk.bf16.mxu1 %vm3270_vm7, %v3597_v60  ;;  %vm1556_vm7 = vcmp.eq.s32.totalorder %v4235_v13, %v1404_v47  ;;  %vm3212_vm13 = vmpackc.low %vm1494_vm10, %vm1492_vm6  ;;  %vm1562_vm6 = vcmp.eq.s32.totalorder %v4235_v13, %v1410_v58  ;;  %vm1501_vm10 = vcmp.eq.s32.totalorder %v4231_v55, %v1349_v15  ;;  %vm1567_vm12 = vcmp.eq.s32.totalorder %v4231_v55, %v1415_v59 }
 0x278   : >> { %vm3282_vm15 = vmpackc.low %vm1567_vm12, %vm1565_vm11  ;;  %vm1570_vm11 = vcmp.eq.s32.totalorder %v4235_v13, %v1418_v6  ;;  %vm1573_vm12 = vcmp.eq.s32.totalorder %v4231_v55, %v1421_v7 }
 0x27d   : >> { %3209 = vmatpush1.bf16.xpose.msk.msra.mxu0 %vm3208_vm0, %v3597_v60  ;;  %vm3276_vm0 = vmpackc.low %vm1558_vm8, %vm1556_vm7  ;;  %vm1503_vm7 = vcmp.eq.s32.totalorder %v4231_v55, %v1351_v22 }
 0x27e   : >> { %3273 = vmatpush1.bf16.xpose.msk.msra.mxu1 %vm3272_vm3, %v3597_v60  ;;  %3211 = vmatprep.subr.msk.bf16.mxu0 %vm3210_vm4, %v3597_v60  ;;  %vm1496_vm3 = vcmp.eq.s32.totalorder %v4235_v13, %v1344_v54  ;;  %vm1498_vm4 = vcmp.eq.s32.totalorder %v4235_v13, %v1346_v56  ;;  %vm3218_vm14 = vmpackc.low %vm1503_vm7, %vm1501_vm10  ;;  %v1251_v56 = vld [vmem:[%s3786_s25 + $0x40] sm:$0xff] }
 0x27f   : >> { %3275 = vmatprep.subr.msk.bf16.mxu1 %vm3274_vm5, %v3597_v60  ;;  %vm1560_vm5 = vcmp.eq.s32.totalorder %v4235_v13, %v1408_v57  ;;  %vm3216_vm8 = vmpackc.low %vm1498_vm4, %vm1496_vm3  ;;  %vm1566_vm3 = vcmp.eq.s32.totalorder %v4235_v13, %v1414_v0  ;;  %vm1569_vm4 = vcmp.eq.s32.totalorder %v4231_v55, %v1417_v2  ;;  %v1254_v0 = vld [vmem:[%s3786_s25 + $0x58] sm:$0xff] }
 0x285   : >> { %3213 = vmatpush1.bf16.xpose.msk.msra.mxu0 %vm3212_vm13, %v3597_v60  ;;  %vm3280_vm13 = vmpackc.low %vm1562_vm6, %vm1560_vm5  ;;  %vm1571_vm5 = vcmp.eq.s32.totalorder %v4231_v55, %v1419_v3  ;;  %v1256_v3 = vld [vmem:[%s3786_s25 + $0x68] sm:$0xff] }
 0x286   : >> { %3277 = vmatpush1.bf16.xpose.msk.msra.mxu1 %vm3276_vm0, %v3597_v60  ;;  %3215 = vmatprep.subr.msk.bf16.mxu0 %vm3214_vm1, %v3597_v60  ;;  %vm1500_vm0 = vcmp.eq.s32.totalorder %v4235_v13, %v1348_v61  ;;  %vm1502_vm1 = vcmp.eq.s32.totalorder %v4235_v13, %v1350_v62  ;;  %vm3286_vm7 = vmpackc.low %vm1571_vm5, %vm1569_vm4  ;;  %v1253_v61 = vld [vmem:[%s3786_s25 + $0x50] sm:$0xff] }
 0x287   : >> { %3279 = vmatprep.subr.msk.bf16.mxu1 %vm3278_vm2, %v3597_v60  ;;  %vm1564_vm2 = vcmp.eq.s32.totalorder %v4235_v13, %v1412_v63  ;;  %vm3220_vm6 = vmpackc.low %vm1502_vm1, %vm1500_vm0  ;;  %vm1572_vm0 = vcmp.eq.s32.totalorder %v4235_v13, %v1420_v16  ;;  %vm1574_vm1 = vcmp.eq.s32.totalorder %v4235_v13, %v1422_v17  ;;  %v1255_v63 = vld [vmem:[%s3786_s25 + $0x60] sm:$0xff]  ;;  %v1260_v17 = vld [vmem:[%s3786_s25 + $0x88] sm:$0xff] }
 0x288   : >> { %vm3284_vm10 = vmpackc.low %vm1566_vm3, %vm1564_vm2  ;;  %vm1577_vm2 = vcmp.eq.s32.totalorder %v4231_v55, %v1425_v21  ;;  %vm1579_vm3 = vcmp.eq.s32.totalorder %v4231_v55, %v1427_v23  ;;  %v1261_v21 = vld [vmem:[%s3786_s25 + $0x90] sm:$0xff] }
 0x289   : >> { %vm3292_vm4 = vmpackc.low %vm1574_vm1, %vm1572_vm0 }
 0x28a   : >> { %vm4496_vm5 = vmpackc.low %vm1579_vm3, %vm1577_vm2 }
 0x28d   : >> { %3217 = vmatpush1.bf16.xpose.msk.msra.mxu0 %vm3216_vm8, %v3597_v60  ;;  %vm1568_vm8 = vcmp.eq.s32.totalorder %v4235_v13, %v1416_v5 }
 0x28e   : >> { %3281 = vmatpush1.bf16.xpose.msk.msra.mxu1 %vm3280_vm13, %v3597_v60  ;;  %3219 = vmatprep.subr.msk.bf16.mxu0 %vm3218_vm14, %v3597_v60  ;;  %vm1575_vm13 = vcmp.eq.s32.totalorder %v4231_v55, %v1423_v10  ;;  %vm3288_vm14 = vmpackc.low %vm1570_vm11, %vm1568_vm8  ;;  %vm1583_vm8 = vcmp.eq.s32.totalorder %v4231_v55, %v1431_v32  ;;  %v1264_v32 = vld [vmem:[%s3786_s25 + $0xa8] sm:$0xff] }
 0x28f   : >> { %3283 = vmatprep.subr.msk.bf16.mxu1 %vm3282_vm15, %v3597_v60  ;;  %vm4460_vm15 = vmpackc.low %vm1575_vm13, %vm1573_vm12  ;;  %vm1580_vm13 = vcmp.eq.s32.totalorder %v4235_v13, %v1428_v35 }
 0x295   : >> { %3221 = vmatpush1.bf16.xpose.msk.msra.mxu0 %vm3220_vm6, %v3597_v60  ;;  %vm1576_vm6 = vcmp.eq.s32.totalorder %v4235_v13, %v1424_v27 }
 0x296   : >> { %3285 = vmatpush1.bf16.xpose.msk.msra.mxu1 %vm3284_vm10, %v3597_v60  ;;  %3287 = vmatprep.subr.msk.bf16.mxu0 %vm3286_vm7, %v3597_v60  ;;  %vm1578_vm10 = vcmp.eq.s32.totalorder %v4235_v13, %v1426_v28 }
 0x297   : >> { %3310 = vmatprep.subr.msk.bf16.mxu1 %vm3286_vm7, %v3597_v60  ;;  %vm1581_vm7 = vcmp.eq.s32.totalorder %v4231_v55, %v1429_v31  ;;  %vm3296_vm11 = vmpackc.low %vm1578_vm10, %vm1576_vm6  ;;  %v1887_v55 = vld [vmem:[%s4332_s21 + $0x60] sm:$0xff]  ;;  %v1265_v31 = vld [vmem:[%s3786_s25 + $0xb0] sm:$0xff] }
 0x298   : >> { %vm3298_vm12 = vmpackc.low %vm1583_vm8, %vm1581_vm7 }
 0x29c   : >> { %1956 = vmatmul.mubr.f32.vlgmr.msra.gmra.mrb[0].mxu0 %v4452_v11 }
 0x29d   : >> { %2069 = vmatmul.mubr.f32.vlgmr.msra.gmra.mrb[0].mxu1 %v4452_v11  ;;  %3289 = vmatpush1.bf16.xpose.msk.msra.mxu0 %vm3288_vm14, %v3597_v60 }
 0x29e   : >> { %3314 = vmatpush1.bf16.xpose.msk.msra.mxu1 %vm3288_vm14, %v3597_v60  ;;  %1961 = vmatprep.mubr.f32.mxu0 %v4457_v12  ;;  %vm1582_vm14 = vcmp.eq.s32.totalorder %v4235_v13, %v1430_v36  ;;  %v1243_v13 = vld [vmem:[%s3786_s25] sm:$0xff] }
 0x29f   : >> { %2074 = vmatprep.mubr.f32.mxu1 %v4457_v12  ;;  %3291 = vmatprep.subr.msk.bf16.mxu0 %vm4460_vm15, %v3597_v60 }
 0x2a0   : >> { %1962 = vmatmul.mubr.f32.gmra.mrb[2].mxu0 %v4467_v18  ;;  %3311 = vmatprep.subr.msk.bf16.mxu1 %vm4460_vm15, %v3597_v60  ;;  %vm3300_vm15 = vmpackc.low %vm1582_vm14, %vm1580_vm13 }
 0x2a1   : >> { %2075 = vmatmul.mubr.f32.gmra.mrb[2].mxu1 %v4467_v18  ;;  %1967 = vmatprep.mubr.f32.mxu0 %v4472_v20 }
 0x2a2   : >> { %2080 = vmatprep.mubr.f32.mxu1 %v4472_v20 }
 0x2a4   : >> { %1968 = vmatmul.mubr.f32.gmra.mrb[4].mxu0 %v4487_v24 }
 0x2a5   : >> { %2081 = vmatmul.mubr.f32.gmra.mrb[4].mxu1 %v4487_v24  ;;  %3293 = vmatpush1.bf16.xpose.msk.msra.mxu0 %vm3292_vm4, %v3597_v60 }
 0x2a6   : >> { %3315 = vmatpush1.bf16.xpose.msk.msra.mxu1 %vm3292_vm4, %v3597_v60  ;;  %1973 = vmatprep.mubr.f32.mxu0 %v4493_v25 }
 0x2a7   : >> { %2086 = vmatprep.mubr.f32.mxu1 %v4493_v25  ;;  %3295 = vmatprep.subr.msk.bf16.mxu0 %vm4496_vm5, %v3597_v60 }
 0x2a8   : >> { %1974 = vmatmul.mubr.f32.gmra.mrb[6].mxu0 %v4503_v29  ;;  %3312 = vmatprep.subr.msk.bf16.mxu1 %vm4496_vm5, %v3597_v60 }
 0x2a9   : >> { %2087 = vmatmul.mubr.f32.gmra.mrb[6].mxu1 %v4503_v29  ;;  %1979 = vmatprep.mubr.f32.mxu0 %v1884_v30 }
 0x2aa   : >> { %2092 = vmatprep.mubr.f32.mxu1 %v1884_v30 }
 0x2ac   : >> { %1980 = vmatmul.mubr.f32.gmra.mrb[8].mxu0 %v1883_v33 }
 0x2ad   : >> { %2093 = vmatmul.mubr.f32.gmra.mrb[8].mxu1 %v1883_v33  ;;  %3297 = vmatpush1.bf16.xpose.msk.msra.mxu0 %vm3296_vm11, %v3597_v60 }
 0x2ae   : >> { %3316 = vmatpush1.bf16.xpose.msk.msra.mxu1 %vm3296_vm11, %v3597_v60  ;;  %1985 = vmatprep.mubr.f32.mxu0 %v1886_v34 }
 0x2af   : >> { %2098 = vmatprep.mubr.f32.mxu1 %v1886_v34  ;;  %3299 = vmatprep.subr.msk.bf16.mxu0 %vm3298_vm12, %v3597_v60 }
 0x2b0   : >> { %1986 = vmatmul.mubr.f32.gmra.mrb[10].mxu0 %v1885_v37  ;;  %3313 = vmatprep.subr.msk.bf16.mxu1 %vm3298_vm12, %v3597_v60 }
 0x2b1   : >> { %2099 = vmatmul.mubr.f32.gmra.mrb[10].mxu1 %v1885_v37  ;;  %1991 = vmatprep.mubr.f32.mxu0 %v1888_v38 }
 0x2b2   : >> { %2104 = vmatprep.mubr.f32.mxu1 %v1888_v38 }
 0x2b4   : >> { %1992 = vmatmul.mubr.f32.gmra.mrb[12].mxu0 %v1887_v55 }
 0x2b5   : >> { %2105 = vmatmul.mubr.f32.gmra.mrb[12].mxu1 %v1887_v55  ;;  %3301 = vmatpush1.bf16.xpose.msk.msra.mxu0 %vm3300_vm15, %v3597_v60 }
 0x2b6   : >> { %3317 = vmatpush1.bf16.xpose.msk.msra.mxu1 %vm3300_vm15, %v3597_v60  ;;  %1997 = vmatprep.mubr.f32.mxu0 %v1890_v39  ;;  %v1245_v60 = vld [vmem:[%s3786_s25 + $0x10] sm:$0xff] }
 0x2b7   : >> { %2110 = vmatprep.mubr.f32.mxu1 %v1890_v39 }
 0x2b8   : >> { %1998 = vmatmul.mubr.f32.gmra.mrb[14].mxu0 %v1889_v40 }
 0x2b9   : >> { %2111 = vmatmul.mubr.f32.gmra.mrb[14].mxu1 %v1889_v40  ;;  %2181 = vmatprep.mubr.f32.mxu0 %v4335_v53  ;;  %v1244_v53 = vld [vmem:[%s3786_s25 + $0x8] sm:$0xff] }
 0x2ba   : >> { %2201 = vmatprep.mubr.f32.mxu1 %v1884_v30 }
 0x2bc   : >> { %2182 = vmatmul.mubr.f32.vlgmr.msra.gmra.mrb[16].mxu0 %v4452_v11 }
 0x2bd   : >> { %2202 = vmatmul.mubr.f32.vlgmr.msra.gmra.mrb[16].mxu1 %v1883_v33  ;;  %2186 = vmatprep.mubr.f32.mxu0 %v4457_v12 }
 0x2be   : >> { %2206 = vmatprep.mubr.f32.mxu1 %v1886_v34  ;;  %v1266_v34 = vld [vmem:[%s3786_s25 + $0xb8] sm:$0xff] }
 0x2c0   : >> { %2187 = vmatmul.mubr.f32.gmra.mrb[18].mxu0 %v4467_v18  ;;  %v1259_v18 = vld [vmem:[%s3786_s25 + $0x80] sm:$0xff] }
 0x2c1   : >> { %2207 = vmatmul.mubr.f32.gmra.mrb[18].mxu1 %v1885_v37  ;;  %2191 = vmatprep.mubr.f32.mxu0 %v4472_v20 }
 0x2c2   : >> { %2211 = vmatprep.mubr.f32.mxu1 %v1888_v38 }
 0x2c4   : >> { %2192 = vmatmul.mubr.f32.gmra.mrb[20].mxu0 %v4487_v24 }
 0x2c5   : >> { %2212 = vmatmul.mubr.f32.gmra.mrb[20].mxu1 %v1887_v55  ;;  %2196 = vmatprep.mubr.f32.mxu0 %v4493_v25 }
 0x2c6   : >> { %2216 = vmatprep.mubr.f32.mxu1 %v1890_v39 }
 0x2c8   : >> { %2197 = vmatmul.mubr.f32.gmra.mrb[22].mxu0 %v4503_v29  ;;  %v1263_v29 = vld [vmem:[%s3786_s25 + $0xa0] sm:$0xff] }
 0x2c9   : >> { %2217 = vmatmul.mubr.f32.gmra.mrb[22].mxu1 %v1889_v40  ;;  %v1268_v40 = vld [vmem:[%s3786_s25 + $0xc8] sm:$0xff] }
 0x36f   : >> { %v1957_v41 = vpop.f32.mrb[0].mxu0 }
 0x370   : >> { %v2222_v43 = vadd.f32 %v1957_v41, %v1243_v13  ;;  %v2070_v44 = vpop.f32.mrb[0].mxu1  ;;  %v1959_v45 = vpop.f32.mrb[1].mxu0 }
 0x371   : >> { %v2224_v46 = vadd.f32 %v2070_v44, %v1245_v60  ;;  %v2223_v47 = vadd.f32 %v1959_v45, %v1244_v53  ;;  %v2072_v48 = vpop.f32.mrb[1].mxu1  ;;  %v1270_v60 = vld [vmem:[%s3786_s25 + $0xd8] sm:$0xff]  ;;  %v1269_v53 = vld [vmem:[%s3786_s25 + $0xd0] sm:$0xff] }
 0x372   : >> { %2262 = vst [vmem:[%s3786_s25] sm:$0xff] %v2222_v43  ;;  %v2225_v50 = vadd.f32 %v2072_v48, %v1246_v42  ;;  %v1271_v42 = vld [vmem:[%s3786_s25 + $0xe0] sm:$0xff] }
 0x373   : >> { %2264 = vst [vmem:[%s3786_s25 + $0x10] sm:$0xff] %v2224_v46  ;;  %2263 = vst [vmem:[%s3786_s25 + $0x8] sm:$0xff] %v2223_v47  ;;  %v1963_v54 = vpop.f32.mrb[2].mxu0 }
 0x374   : >> { %2265 = vst [vmem:[%s3786_s25 + $0x18] sm:$0xff] %v2225_v50  ;;  %v2227_v57 = vadd.f32 %v1963_v54, %v1248_v49  ;;  %v2076_v58 = vpop.f32.mrb[2].mxu1  ;;  %v1965_v15 = vpop.f32.mrb[3].mxu0  ;;  %v1273_v49 = vld [vmem:[%s3786_s25 + $0xf0] sm:$0xff] }
 0x375   : >> { %v2229_v22 = vadd.f32 %v2076_v58, %v1250_v51  ;;  %v2228_v19 = vadd.f32 %v1965_v15, %v1249_v52  ;;  %v2078_v59 = vpop.f32.mrb[3].mxu1  ;;  %v1275_v51 = vld [vmem:[%s3786_s25 + $0x100] sm:$0xff]  ;;  %v1274_v52 = vld [vmem:[%s3786_s25 + $0xf8] sm:$0xff] }
 0x376   : >> { %2267 = vst [vmem:[%s3786_s25 + $0x28] sm:$0xff] %v2227_v57  ;;  %v2230_v62 = vadd.f32 %v2078_v59, %v1251_v56  ;;  %v1276_v56 = vld [vmem:[%s3786_s25 + $0x108] sm:$0xff] }
 0x377   : >> { %2269 = vst [vmem:[%s3786_s25 + $0x38] sm:$0xff] %v2229_v22  ;;  %2268 = vst [vmem:[%s3786_s25 + $0x30] sm:$0xff] %v2228_v19  ;;  %v1969_v2 = vpop.f32.mrb[4].mxu0 }
 0x378   : >> { %2270 = vst [vmem:[%s3786_s25 + $0x40] sm:$0xff] %v2230_v62  ;;  %v2232_v5 = vadd.f32 %v1969_v2, %v1253_v61  ;;  %v2082_v6 = vpop.f32.mrb[4].mxu1  ;;  %v1971_v7 = vpop.f32.mrb[5].mxu0  ;;  %v1278_v61 = vld [vmem:[%s3786_s25 + $0x118] sm:$0xff] }
 0x379   : >> { %v2234_v10 = vadd.f32 %v2082_v6, %v1255_v63  ;;  %v2233_v11 = vadd.f32 %v1971_v7, %v1254_v0  ;;  %v2084_v12 = vpop.f32.mrb[5].mxu1  ;;  %v1280_v63 = vld [vmem:[%s3786_s25 + $0x128] sm:$0xff]  ;;  %v1279_v0 = vld [vmem:[%s3786_s25 + $0x120] sm:$0xff] }
 0x37a   : >> { %2272 = vst [vmem:[%s3786_s25 + $0x50] sm:$0xff] %v2232_v5  ;;  %v2235_v16 = vadd.f32 %v2084_v12, %v1256_v3  ;;  %v1281_v3 = vld [vmem:[%s3786_s25 + $0x130] sm:$0xff] }
 0x37b   : >> { %2274 = vst [vmem:[%s3786_s25 + $0x60] sm:$0xff] %v2234_v10  ;;  %2273 = vst [vmem:[%s3786_s25 + $0x58] sm:$0xff] %v2233_v11  ;;  %v1975_v20 = vpop.f32.mrb[6].mxu0 }
 0x37c   : >> { %2275 = vst [vmem:[%s3786_s25 + $0x68] sm:$0xff] %v2235_v16  ;;  %v2237_v23 = vadd.f32 %v1975_v20, %v1258_v14  ;;  %v2088_v24 = vpop.f32.mrb[6].mxu1  ;;  %v1977_v25 = vpop.f32.mrb[7].mxu0  ;;  %v1247_v14 = vld [vmem:[%s3786_s25 + $0x20] sm:$0xff] }
 0x37d   : >> { %v2239_v26 = vadd.f32 %v2088_v24, %v1260_v17  ;;  %v2238_v27 = vadd.f32 %v1977_v25, %v1259_v18  ;;  %v2090_v28 = vpop.f32.mrb[7].mxu1  ;;  %v1267_v17 = vld [vmem:[%s3786_s25 + $0xc0] sm:$0xff] }
 0x37e   : >> { %2277 = vst [vmem:[%s3786_s25 + $0x78] sm:$0xff] %v2237_v23  ;;  %v2240_v30 = vadd.f32 %v2090_v28, %v1261_v21 }
 0x37f   : >> { %2279 = vst [vmem:[%s3786_s25 + $0x88] sm:$0xff] %v2239_v26  ;;  %2278 = vst [vmem:[%s3786_s25 + $0x80] sm:$0xff] %v2238_v27  ;;  %v1981_v33 = vpop.f32.mrb[8].mxu0  ;;  %v1252_v26 = vld [vmem:[%s3786_s25 + $0x48] sm:$0xff] }
 0x380   : >> { %2280 = vst [vmem:[%s3786_s25 + $0x90] sm:$0xff] %v2240_v30  ;;  %v2242_v35 = vadd.f32 %v1981_v33, %v1263_v29  ;;  %v2094_v36 = vpop.f32.mrb[8].mxu1  ;;  %v1983_v37 = vpop.f32.mrb[9].mxu0  ;;  %v1272_v27 = vld [vmem:[%s3786_s25 + $0xe8] sm:$0xff] }
 0x381   : >> { %v2244_v38 = vadd.f32 %v2094_v36, %v1265_v31  ;;  %v2243_v55 = vadd.f32 %v1983_v37, %v1264_v32  ;;  %v2096_v39 = vpop.f32.mrb[9].mxu1 }
 0x382   : >> { %2282 = vst [vmem:[%s3786_s25 + $0xa0] sm:$0xff] %v2242_v35  ;;  %v2245_v13 = vadd.f32 %v2096_v39, %v1266_v34  ;;  %v1257_v34 = vld [vmem:[%s3786_s25 + $0x70] sm:$0xff] }
 0x383   : >> { %2284 = vst [vmem:[%s3786_s25 + $0xb0] sm:$0xff] %v2244_v38  ;;  %2283 = vst [vmem:[%s3786_s25 + $0xa8] sm:$0xff] %v2243_v55  ;;  %v1987_v41 = vpop.f32.mrb[10].mxu0  ;;  %v1277_v35 = vld [vmem:[%s3786_s25 + $0x110] sm:$0xff] }
 0x384   : >> { %2285 = vst [vmem:[%s3786_s25 + $0xb8] sm:$0xff] %v2245_v13  ;;  %v2247_v43 = vadd.f32 %v1987_v41, %v1268_v40  ;;  %v2100_v44 = vpop.f32.mrb[10].mxu1  ;;  %v1989_v45 = vpop.f32.mrb[11].mxu0  ;;  %v1262_v13 = vld [vmem:[%s3786_s25 + $0x98] sm:$0xff] }
 0x385   : >> { %v2249_v46 = vadd.f32 %v2100_v44, %v1270_v60  ;;  %v2248_v47 = vadd.f32 %v1989_v45, %v1269_v53  ;;  %v2102_v48 = vpop.f32.mrb[11].mxu1  ;;  %v1282_v60 = vld [vmem:[%s3786_s25 + $0x138] sm:$0xff] }
 0x386   : >> { %2287 = vst [vmem:[%s3786_s25 + $0xc8] sm:$0xff] %v2247_v43  ;;  %v2250_v50 = vadd.f32 %v2102_v48, %v1271_v42 }
 0x387   : >> { %2289 = vst [vmem:[%s3786_s25 + $0xd8] sm:$0xff] %v2249_v46  ;;  %2288 = vst [vmem:[%s3786_s25 + $0xd0] sm:$0xff] %v2248_v47  ;;  %v1993_v54 = vpop.f32.mrb[12].mxu0 }
 0x388   : >> { %2290 = vst [vmem:[%s3786_s25 + $0xe0] sm:$0xff] %v2250_v50  ;;  %v2252_v57 = vadd.f32 %v1993_v54, %v1273_v49  ;;  %v2106_v58 = vpop.f32.mrb[12].mxu1  ;;  %v1995_v15 = vpop.f32.mrb[13].mxu0 }
 0x389   : >> { %v2254_v22 = vadd.f32 %v2106_v58, %v1275_v51  ;;  %v2253_v19 = vadd.f32 %v1995_v15, %v1274_v52  ;;  %v2108_v59 = vpop.f32.mrb[13].mxu1 }
 0x38a   : >> { %2292 = vst [vmem:[%s3786_s25 + $0xf0] sm:$0xff] %v2252_v57  ;;  %v2255_v62 = vadd.f32 %v2108_v59, %v1276_v56 }
 0x38b   : >> { %2294 = vst [vmem:[%s3786_s25 + $0x100] sm:$0xff] %v2254_v22  ;;  %2293 = vst [vmem:[%s3786_s25 + $0xf8] sm:$0xff] %v2253_v19  ;;  %v1999_v2 = vpop.f32.mrb[14].mxu0 }
 0x38c   : >> { %2295 = vst [vmem:[%s3786_s25 + $0x108] sm:$0xff] %v2255_v62  ;;  %v2257_v5 = vadd.f32 %v1999_v2, %v1278_v61  ;;  %v2112_v6 = vpop.f32.mrb[14].mxu1  ;;  %v2001_v7 = vpop.f32.mrb[15].mxu0 }
 0x38d   : >> { %v2259_v10 = vadd.f32 %v2112_v6, %v1280_v63  ;;  %v2258_v11 = vadd.f32 %v2001_v7, %v1279_v0  ;;  %v2114_v12 = vpop.f32.mrb[15].mxu1 }
 0x38e   : >> { %2297 = vst [vmem:[%s3786_s25 + $0x118] sm:$0xff] %v2257_v5  ;;  %v2260_v16 = vadd.f32 %v2114_v12, %v1281_v3 }
 0x38f   : >> { %2299 = vst [vmem:[%s3786_s25 + $0x128] sm:$0xff] %v2259_v10  ;;  %2298 = vst [vmem:[%s3786_s25 + $0x120] sm:$0xff] %v2258_v11  ;;  %v2183_v18 = vpop.f32.mrb[16].mxu0 }
 0x390   : >> { %2300 = vst [vmem:[%s3786_s25 + $0x130] sm:$0xff] %v2260_v16  ;;  %v2226_v20 = vadd.f32 %v2183_v18, %v1247_v14  ;;  %v2203_v21 = vpop.f32.mrb[16].mxu1  ;;  %v2185_v23 = vpop.f32.mrb[17].mxu0 }
 0x391   : >> { %v2246_v24 = vadd.f32 %v2203_v21, %v1267_v17  ;;  %v2205_v25 = vpop.f32.mrb[17].mxu1 }
 0x392   : >> { %2266 = vst.msk [vmem:[%s3786_s25 + $0x20] sm:$0xff] %vm1200_vm9, %v2226_v20 }
 0x393   : >> { %2286 = vst.msk [vmem:[%s3786_s25 + $0xc0] sm:$0xff] %vm1200_vm9, %v2246_v24  ;;  %v2188_v28 = vpop.f32.mrb[18].mxu0 }
 0x394   : >> { %v2231_v29 = vadd.f32 %v2188_v28, %v1252_v26  ;;  %v2208_v30 = vpop.f32.mrb[18].mxu1  ;;  %v2190_v31 = vpop.f32.mrb[19].mxu0 }
 0x395   : >> { %v2251_v32 = vadd.f32 %v2208_v30, %v1272_v27  ;;  %v2210_v33 = vpop.f32.mrb[19].mxu1 }
 0x396   : >> { %2271 = vst.msk [vmem:[%s3786_s25 + $0x48] sm:$0xff] %vm1200_vm9, %v2231_v29 }
 0x397   : >> { %2291 = vst.msk [vmem:[%s3786_s25 + $0xe8] sm:$0xff] %vm1200_vm9, %v2251_v32  ;;  %v2193_v36 = vpop.f32.mrb[20].mxu0 }
 0x398   : >> { %v2236_v37 = vadd.f32 %v2193_v36, %v1257_v34  ;;  %v2213_v38 = vpop.f32.mrb[20].mxu1  ;;  %v2195_v55 = vpop.f32.mrb[21].mxu0 }
 0x399   : >> { %v2256_v39 = vadd.f32 %v2213_v38, %v1277_v35  ;;  %v2215_v40 = vpop.f32.mrb[21].mxu1  ;;  %1242 = sbr.rel (!%p1239_p4) target bundleno = 529 (0x211), region = 92 }
 0x39a   : >> { %2276 = vst.msk [vmem:[%s3786_s25 + $0x70] sm:$0xff] %vm1200_vm9, %v2236_v37 }
 0x39b   : >> { %2296 = vst.msk [vmem:[%s3786_s25 + $0x110] sm:$0xff] %vm1200_vm9, %v2256_v39  ;;  %v2198_v53 = vpop.f32.mrb[22].mxu0 }
 0x39c   : >> { %v2241_v41 = vadd.f32 %v2198_v53, %v1262_v13  ;;  %v2218_v42 = vpop.f32.mrb[22].mxu1  ;;  %v2200_v43 = vpop.f32.mrb[23].mxu0 }
 0x39d   : >> { %v2261_v44 = vadd.f32 %v2218_v42, %v1282_v60  ;;  %v2220_v45 = vpop.f32.mrb[23].mxu1 }
 0x39e   : >> { %2281 = vst.msk [vmem:[%s3786_s25 + $0x98] sm:$0xff] %vm1200_vm9, %v2241_v41 }
 0x39f   : >> { %2301 = vst.msk [vmem:[%s3786_s25 + $0x138] sm:$0xff] %vm1200_vm9, %v2261_v44 }
 0x3a0 PF: > { %s3319_s27 = smul.u32 5120, %s3575_s9  ;;  %s2318_s28 = sshll.u32 %s3786_s25, 4  ;;  %s4643_s28 = int_to_ptr.vmem [resolvable:$true] %s2318_s28 }
 0x3a1   : > { %s4647_s7 = scalar_lea.sflag [#allocation7], %s200_s24  ;;  %s3491_s26 = scalar_lea.vmem %s4643_s28, 5120 }
 0x3a2   : > { %s4641_s6 = scalar_lea.hbm %s4697_s5, %s3319_s27  ;;  %p3492_p5 = scmp.ne.s32.totalorder %s4643_s28, %s3491_s26 }
 0x3a3   : > { %p4718_p10 = scmp.ne.s32.totalorder %s4703_s16, 0  ;;  %s3598_s9 = smov [#allocation10]  }
 0x3a4   : > { %s3495_s15 = sshll.u32 %s3598_s9, 4  ;;  %s3496_s15 = int_to_ptr.vmem [resolvable:$false] %s3495_s15 }
 0x3a5   : > { %p3493_p11 = pnand %p3492_p5, %p4718_p10  ;;  %s3497_s25 = scalar_lea.vmem %s3496_s15, 10240 }
 0x3a6   : > { %p3498_p0 = scmp.lt.s32.totalorder %s4643_s28, %s3496_s15  ;;  %p3499_p1 = scmp.lt.s32.totalorder %s3497_s25, %s3491_s26 }
 0x3a7   : > { %p3494_p13 = pneg %p3493_p11 }
 0x3a8   : > { %p3500_p3 = por %p3499_p1, %p3498_p0 }
 0x3aa   : > { %p3501_p6 = pnand %p3500_p3, %p3494_p13 }
 0x3ac   : > { %3504 = shalt.err (!%p3501_p6)
}
 0x3ad   : > { %s3505_s24 = scalar_lea.hbm %s4641_s6, 5120  ;;  %s3509_s13 = scalar_lea.hbm %s4697_s5, 15360 }
 0x3ae   : > { %p3506_p8 = scmp.ne.s32.totalorder %s4641_s6, %s3505_s24  ;;  %p3510_p9 = scmp.lt.u32.totalorder %s4641_s6, %s4697_s5 }
 0x3af   : > { %p3511_p2 = scmp.lt.u32.totalorder %s3509_s13, %s3505_s24  ;;  %p3513_p5 = scmp.lt.u32.totalorder %s3505_s24, %s4641_s6 }
 0x3b0   : > { %p3507_p12 = pnand %p3506_p8, %p4718_p10 }
 0x3b1   : > { %p3512_p4 = por %p3511_p2, %p3510_p9 }
 0x3b2   : > { %p3508_p7 = pneg %p3507_p12 }
 0x3b3   : > { %p3514_p11 = por %p3513_p5, %p3512_p4 }
 0x3b5   : > { %p3515_p13 = pnand %p3514_p11, %p3508_p7 }
 0x3b7   : > { %3518 = shalt.err (!%p3515_p13)
}
 0x3b8   : > { %s3599_s17 = smov 640   ;;  %s3600_s21 = smov 40  }
 0x3b9   : > { %3328 = dma.vmem_to_hbm [thread:$0]  (%p4718_p10), %s4643_s28, 5120, %s4641_s6, %s4647_s7, %s3599_s17, %s3599_s17, %s3600_s21  }
 0x3ba PF: > { %p3345_p0 = scmp.ge.s32.totalorder %s3583_s11, 2  ;;  %s2333_s27 = sand.u32 1, %s3563_s0  }
 0x3bb   : > { %p4719_p1 = scmp.ne.s32.totalorder %s4704_s18, 0  ;;  %s2334_s29 = scalar_lea.sflag [#allocation7], %s2333_s27 }
 0x3bd   : > { %p3338_p3 = pnand %p3345_p0, %p4719_p1 }
 0x3bf   : > { %3558 = dma.done.wait (!%p3338_p3), %s2334_s29, 5120  }
 0x3c0   : > { %3560 = vsyncadd (!%p3338_p3), %s2334_s29, 4294962176  ;;  %s28_s11 = sadd.s32 1, %s3583_s11   ;;  %s4720_s0 = smov %s3567_s1 }
 0x3c1   : > { %p25_p6 = scmp.ge.s32.totalorder %s28_s11, 5   ;;  %s4721_s1 = smov %s3571_s8 }
 0x3c2   : > { %s4722_s8 = smov %s3699_s19  ;;  %s4723_s9 = smov %s3579_s10 }
 0x3c3   : > { %s4724_s10 = smov %s4726_s14  ;;  %27 = sbr.rel (!%p25_p6) target bundleno = 28 (0x1c), region = 103 }
 0x3ca   :  { %2339 = vsyncpa [#allocation6], 1 }
 0x3cb   :  { %2341 = vsyncpa [#allocation6 + $0x1], 1 }
 0x3cc   :  { %2342 = vsyncpa [#allocation9], 1 }
 0x3cd   :  { %2343 = vsyncpa [#allocation7], 1 }
 0x3ce   :  { %2345 = vsyncpa [#allocation7 + $0x1], 1 }

</bundles_post_ra>
